<compile_context>
chip_gen: v7x
topology: tpu7x:2x2x1
jax: 0.10.0
libtpu: 0.0.40
codegen_flags: <defaults>
</compile_context>

<pallas_src>
import math

import jax
import jax.numpy as jnp
from jax.experimental import pallas as pl
from jax.experimental.pallas import tpu as pltpu

IN_DIM = 784      # encoder input  (flattened 28x28)
H_ENC = 256       # encoder hidden
LATENT = 2        # true latent size
LATENT_PAD = 8    # sublane-aligned padded latent size used inside the kernel
H_DEC = 512       # decoder hidden


def _round_up(n, m):
    return (n + m - 1) // m * m


def _vae_kernel(x_ref, eps_ref,
                w1_ref, b1_ref,
                w2_ref, b2_ref,
                w3_ref, b3_ref,
                w4_ref, b4_ref,
                xr_ref, mean_ref, logvar_ref):
    # ---- Encoder: h = relu(x @ W1 + b1) ---- (bf16 MXU, f32 accumulate)
    x = x_ref[...].astype(jnp.bfloat16)
    h = jnp.dot(x, w1_ref[...], preferred_element_type=jnp.float32) + b1_ref[...]
    h = jnp.maximum(h, 0.0)

    # ---- fused mean|logvar head: one MXU pass, lanes split afterwards ----
    ml = jnp.dot(h.astype(jnp.bfloat16), w2_ref[...],
                 preferred_element_type=jnp.float32) + b2_ref[...]
    mean = ml[:, :LATENT_PAD]
    logvar = ml[:, LATENT_PAD:]

    # ---- reparameterize (f32): z = mean + eps * exp(0.5 * logvar) ----
    std = jnp.exp(0.5 * logvar)
    z = mean + eps_ref[...] * std

    # ---- Decoder: sigmoid(relu(z @ W3 + b3) @ W4 + b4) ----
    h2 = jnp.dot(z.astype(jnp.bfloat16), w3_ref[...],
                 preferred_element_type=jnp.float32) + b3_ref[...]
    h2 = jnp.maximum(h2, 0.0)
    logits = jnp.dot(h2.astype(jnp.bfloat16), w4_ref[...],
                     preferred_element_type=jnp.float32) + b4_ref[...]
    xr_ref[...] = jax.nn.sigmoid(logits)

    mean_ref[...] = mean
    logvar_ref[...] = logvar


def vae_forward(x, eps, params, *, block_b=256):
    """x: (B, 784) f32.  eps: (B, k) f32 standard normal, k in {LATENT, LATENT_PAD};
    only the first LATENT columns influence the result (padded w3 rows are zero).
    Returns (x_reconstructed (B, 784), mean (B, 2), logvar (B, 2))."""
    B = x.shape[0]
    tb = min(block_b, _round_up(B, 8))   # batch tile (sublane-aligned)
    Bp = _round_up(B, tb)

    if eps.shape[1] < LATENT_PAD:
        eps = jnp.pad(eps, ((0, 0), (0, LATENT_PAD - eps.shape[1])))
    if Bp != B:
        x = jnp.pad(x, ((0, Bp - B), (0, 0)))
        eps = jnp.pad(eps, ((0, Bp - B), (0, 0)))

    row = lambda i: (i, 0)   # batch-streamed operands
    rep = lambda i: (0, 0)   # grid-invariant operands (stay VMEM-resident)

    xr, mean_p, logvar_p = pl.pallas_call(
        _vae_kernel,
        grid=(Bp // tb,),
        in_specs=[
            pl.BlockSpec((tb, IN_DIM), row),             # x
            pl.BlockSpec((tb, LATENT_PAD), row),         # eps
            pl.BlockSpec((IN_DIM, H_ENC), rep),          # w1 (bf16)
            pl.BlockSpec((1, H_ENC), rep),               # b1 (f32)
            pl.BlockSpec((H_ENC, 2 * LATENT_PAD), rep),  # fused mean|logvar W (bf16)
            pl.BlockSpec((1, 2 * LATENT_PAD), rep),      # fused mean|logvar b (f32)
            pl.BlockSpec((LATENT_PAD, H_DEC), rep),      # w3 (bf16)
            pl.BlockSpec((1, H_DEC), rep),               # b3 (f32)
            pl.BlockSpec((H_DEC, IN_DIM), rep),          # w4 (bf16)
            pl.BlockSpec((1, IN_DIM), rep),              # b4 (f32)
        ],
        out_specs=(
            pl.BlockSpec((tb, IN_DIM), row),
            pl.BlockSpec((tb, LATENT_PAD), row),
            pl.BlockSpec((tb, LATENT_PAD), row),
        ),
        out_shape=(
            jax.ShapeDtypeStruct((Bp, IN_DIM), jnp.float32),
            jax.ShapeDtypeStruct((Bp, LATENT_PAD), jnp.float32),
            jax.ShapeDtypeStruct((Bp, LATENT_PAD), jnp.float32),
        ),
        compiler_params=pltpu.CompilerParams(
            dimension_semantics=("parallel",)),
    )(x, eps,
      params["w1"], params["b1"],
      params["w2"], params["b2"],
      params["w3"], params["b3"],
      params["w4"], params["b4"])

    return xr[:B], mean_p[:B, :LATENT], logvar_p[:B, :LATENT]


def init_params(key):
    """Deterministic nn.Linear-style init U(-1/sqrt(fan_in), 1/sqrt(fan_in)).
    Weights stored as (in, out) so the kernel computes x @ W + b, then cast to
    bf16; biases stay f32.  Latent dims are zero-padded to LATENT_PAD and the
    mean/logvar heads are fused column-wise (padding is mathematically inert)."""
    ks = jax.random.split(key, 5)

    def linear(kk, fan_in, fan_out):
        kw, kb = jax.random.split(kk)
        bound = 1.0 / math.sqrt(fan_in)
        w = jax.random.uniform(kw, (fan_in, fan_out), jnp.float32, -bound, bound)
        b = jax.random.uniform(kb, (1, fan_out), jnp.float32, -bound, bound)
        return w, b

    w1, b1 = linear(ks[0], IN_DIM, H_ENC)
    w2m, b2m = linear(ks[1], H_ENC, LATENT)
    w2l, b2l = linear(ks[2], H_ENC, LATENT)
    w3, b3 = linear(ks[3], LATENT, H_DEC)
    w4, b4 = linear(ks[4], H_DEC, IN_DIM)

    # fused mean|logvar head, each half zero-padded to LATENT_PAD lanes
    w2 = jnp.zeros((H_ENC, 2 * LATENT_PAD), jnp.float32)
    w2 = w2.at[:, :LATENT].set(w2m).at[:, LATENT_PAD:LATENT_PAD + LATENT].set(w2l)
    b2 = jnp.zeros((1, 2 * LATENT_PAD), jnp.float32)
    b2 = b2.at[:, :LATENT].set(b2m).at[:, LATENT_PAD:LATENT_PAD + LATENT].set(b2l)
    # decoder first layer with zero-padded (inert) latent input rows
    w3p = jnp.zeros((LATENT_PAD, H_DEC), jnp.float32).at[:LATENT, :].set(w3)

    bf = lambda w: w.astype(jnp.bfloat16)
    return dict(w1=bf(w1), b1=b1, w2=bf(w2), b2=b2,
                w3=bf(w3p), b3=b3, w4=bf(w4), b4=b4)


def vae_reference(x, eps, params):
    """Pure-JAX reference using the same bf16 weights / f32 accumulation."""
    def dot(a, w):
        return jnp.dot(a.astype(jnp.bfloat16), w,
                       preferred_element_type=jnp.float32)
    h = jnp.maximum(dot(x, params["w1"]) + params["b1"], 0.0)
    ml = dot(h, params["w2"]) + params["b2"]
    mean, logvar = ml[:, :LATENT_PAD], ml[:, LATENT_PAD:]
    z = mean + eps * jnp.exp(0.5 * logvar)
    h2 = jnp.maximum(dot(z, params["w3"]) + params["b3"], 0.0)
    xr = jax.nn.sigmoid(dot(h2, params["w4"]) + params["b4"])
    return xr, mean[:, :LATENT], logvar[:, :LATENT]


if __name__ == "__main__":
    key = jax.random.PRNGKey(0)
    k_param, k_x, k_eps = jax.random.split(key, 3)

    B = 8
    params = init_params(k_param)
    # small deterministic input batch (flattened 28x28 images in [0, 1))
    x = jax.random.uniform(k_x, (B, IN_DIM), jnp.float32)
    # epsilon ~ N(0,1) (torch.randn_like in reparameterize); generated directly
    # at the padded lane width so the wrapper needs no pad op — only the first
    # LATENT columns affect the result.
    eps = jax.random.normal(k_eps, (B, LATENT_PAD), jnp.float32)

    x_rec, mean, logvar = jax.jit(vae_forward)(x, eps, params)
    jax.block_until_ready((x_rec, mean, logvar))

    assert x_rec.shape == (B, IN_DIM)
    assert mean.shape == (B, LATENT)
    assert logvar.shape == (B, LATENT)

    # sanity check against a pure-JAX reference with the same bf16 weights
    xr_ref, mean_ref, logvar_ref = vae_reference(x, eps, params)
    assert jnp.allclose(x_rec, xr_ref, atol=2e-2), "x_rec mismatch"
    assert jnp.allclose(mean, mean_ref, atol=2e-2, rtol=2e-2), "mean mismatch"
    assert jnp.allclose(logvar, logvar_ref, atol=2e-2, rtol=2e-2), "logvar mismatch"

    print("KERNEL_OK")
</pallas_src>

<mosaic_0001>
module attributes {stable_mosaic.version = 11 : i64} {
  func.func @_vae_kernel(%arg0: i32, %arg1: memref<8x784xf32, #tpu.memory_space<vmem>>, %arg2: memref<8x8xf32, #tpu.memory_space<vmem>>, %arg3: memref<784x256xbf16, #tpu.memory_space<vmem>>, %arg4: memref<1x256xf32, #tpu.memory_space<vmem>>, %arg5: memref<256x16xbf16, #tpu.memory_space<vmem>>, %arg6: memref<1x16xf32, #tpu.memory_space<vmem>>, %arg7: memref<8x512xbf16, #tpu.memory_space<vmem>>, %arg8: memref<1x512xf32, #tpu.memory_space<vmem>>, %arg9: memref<512x784xbf16, #tpu.memory_space<vmem>>, %arg10: memref<1x784xf32, #tpu.memory_space<vmem>>, %arg11: memref<8x784xf32, #tpu.memory_space<vmem>>, %arg12: memref<8x8xf32, #tpu.memory_space<vmem>>, %arg13: memref<8x8xf32, #tpu.memory_space<vmem>>) attributes {dimension_semantics = [#tpu.dimension_semantics<parallel>], iteration_bounds = array<i64: 1>, scalar_prefetch = 0 : i64, scratch_operands = 0 : i64, tpu.core_type = #tpu.core_type<tc>, window_params = [{transform_indices = @transform_0, window_bounds = array<i64: 8, 784>}, {transform_indices = @transform_1, window_bounds = array<i64: 8, 8>}, {pipeline_mode = #tpu.pipeline_mode<synchronous>, transform_indices = @transform_2, window_bounds = array<i64: 784, 256>}, {pipeline_mode = #tpu.pipeline_mode<synchronous>, transform_indices = @transform_3, window_bounds = array<i64: 1, 256>}, {pipeline_mode = #tpu.pipeline_mode<synchronous>, transform_indices = @transform_4, window_bounds = array<i64: 256, 16>}, {pipeline_mode = #tpu.pipeline_mode<synchronous>, transform_indices = @transform_5, window_bounds = array<i64: 1, 16>}, {pipeline_mode = #tpu.pipeline_mode<synchronous>, transform_indices = @transform_6, window_bounds = array<i64: 8, 512>}, {pipeline_mode = #tpu.pipeline_mode<synchronous>, transform_indices = @transform_7, window_bounds = array<i64: 1, 512>}, {pipeline_mode = #tpu.pipeline_mode<synchronous>, transform_indices = @transform_8, window_bounds = array<i64: 512, 784>}, {pipeline_mode = #tpu.pipeline_mode<synchronous>, transform_indices = @transform_9, window_bounds = array<i64: 1, 784>}, {transform_indices = @transform_10, window_bounds = array<i64: 8, 784>}, {transform_indices = @transform_11, window_bounds = array<i64: 8, 8>}, {transform_indices = @transform_12, window_bounds = array<i64: 8, 8>}]} {
    %c0 = arith.constant 0 : index
    %c0_0 = arith.constant 0 : index
    %0 = vector.load %arg1[%c0, %c0_0] : memref<8x784xf32, #tpu.memory_space<vmem>>, vector<8x784xf32>
    %1 = arith.truncf %0 : vector<8x784xf32> to vector<8x784xbf16>
    %c0_1 = arith.constant 0 : index
    %c0_2 = arith.constant 0 : index
    %2 = vector.load %arg3[%c0_1, %c0_2] : memref<784x256xbf16, #tpu.memory_space<vmem>>, vector<784x256xbf16>
    %cst = arith.constant dense<0.000000e+00> : vector<8x256xf32>
    %3 = tpu.matmul %1, %2, %cst {dimension_numbers = #tpu.dot_dimension_numbers<[1], [0], [0], [1], [0, 0, 1, 1], [], []>} : vector<8x784xbf16>, vector<784x256xbf16>, vector<8x256xf32> -> vector<8x256xf32>
    %c0_3 = arith.constant 0 : index
    %c0_4 = arith.constant 0 : index
    %4 = vector.load %arg4[%c0_3, %c0_4] : memref<1x256xf32, #tpu.memory_space<vmem>>, vector<1x256xf32>
    %5 = vector.broadcast %4 : vector<1x256xf32> to vector<8x256xf32>
    %6 = arith.addf %3, %5 : vector<8x256xf32>
    %cst_5 = arith.constant 0.000000e+00 : f32
    %7 = vector.broadcast %cst_5 : f32 to vector<8x256xf32>
    %8 = arith.maximumf %6, %7 : vector<8x256xf32>
    %9 = arith.truncf %8 : vector<8x256xf32> to vector<8x256xbf16>
    %c0_6 = arith.constant 0 : index
    %c0_7 = arith.constant 0 : index
    %10 = vector.load %arg5[%c0_6, %c0_7] : memref<256x16xbf16, #tpu.memory_space<vmem>>, vector<256x16xbf16>
    %cst_8 = arith.constant dense<0.000000e+00> : vector<8x16xf32>
    %11 = tpu.matmul %9, %10, %cst_8 {dimension_numbers = #tpu.dot_dimension_numbers<[1], [0], [0], [1], [0, 0, 1, 1], [], []>} : vector<8x256xbf16>, vector<256x16xbf16>, vector<8x16xf32> -> vector<8x16xf32>
    %c0_9 = arith.constant 0 : index
    %c0_10 = arith.constant 0 : index
    %12 = vector.load %arg6[%c0_9, %c0_10] : memref<1x16xf32, #tpu.memory_space<vmem>>, vector<1x16xf32>
    %13 = vector.broadcast %12 : vector<1x16xf32> to vector<8x16xf32>
    %14 = arith.addf %11, %13 : vector<8x16xf32>
    %15 = vector.extract_strided_slice %14 {offsets = [0, 0], sizes = [8, 8], strides = [1, 1]} : vector<8x16xf32> to vector<8x8xf32>
    %16 = vector.extract_strided_slice %14 {offsets = [0, 8], sizes = [8, 8], strides = [1, 1]} : vector<8x16xf32> to vector<8x8xf32>
    %cst_11 = arith.constant 5.000000e-01 : f32
    %17 = vector.broadcast %cst_11 : f32 to vector<8x8xf32>
    %18 = arith.mulf %17, %16 : vector<8x8xf32>
    %19 = math.exp %18 : vector<8x8xf32>
    %c0_12 = arith.constant 0 : index
    %c0_13 = arith.constant 0 : index
    %20 = vector.load %arg2[%c0_12, %c0_13] : memref<8x8xf32, #tpu.memory_space<vmem>>, vector<8x8xf32>
    %21 = arith.mulf %20, %19 : vector<8x8xf32>
    %22 = arith.addf %15, %21 : vector<8x8xf32>
    %23 = arith.truncf %22 : vector<8x8xf32> to vector<8x8xbf16>
    %c0_14 = arith.constant 0 : index
    %c0_15 = arith.constant 0 : index
    %24 = vector.load %arg7[%c0_14, %c0_15] : memref<8x512xbf16, #tpu.memory_space<vmem>>, vector<8x512xbf16>
    %cst_16 = arith.constant dense<0.000000e+00> : vector<8x512xf32>
    %25 = tpu.matmul %23, %24, %cst_16 {dimension_numbers = #tpu.dot_dimension_numbers<[1], [0], [0], [1], [0, 0, 1, 1], [], []>} : vector<8x8xbf16>, vector<8x512xbf16>, vector<8x512xf32> -> vector<8x512xf32>
    %c0_17 = arith.constant 0 : index
    %c0_18 = arith.constant 0 : index
    %26 = vector.load %arg8[%c0_17, %c0_18] : memref<1x512xf32, #tpu.memory_space<vmem>>, vector<1x512xf32>
    %27 = vector.broadcast %26 : vector<1x512xf32> to vector<8x512xf32>
    %28 = arith.addf %25, %27 : vector<8x512xf32>
    %cst_19 = arith.constant 0.000000e+00 : f32
    %29 = vector.broadcast %cst_19 : f32 to vector<8x512xf32>
    %30 = arith.maximumf %28, %29 : vector<8x512xf32>
    %31 = arith.truncf %30 : vector<8x512xf32> to vector<8x512xbf16>
    %c0_20 = arith.constant 0 : index
    %c0_21 = arith.constant 0 : index
    %32 = vector.load %arg9[%c0_20, %c0_21] : memref<512x784xbf16, #tpu.memory_space<vmem>>, vector<512x784xbf16>
    %cst_22 = arith.constant dense<0.000000e+00> : vector<8x784xf32>
    %33 = tpu.matmul %31, %32, %cst_22 {dimension_numbers = #tpu.dot_dimension_numbers<[1], [0], [0], [1], [0, 0, 1, 1], [], []>} : vector<8x512xbf16>, vector<512x784xbf16>, vector<8x784xf32> -> vector<8x784xf32>
    %c0_23 = arith.constant 0 : index
    %c0_24 = arith.constant 0 : index
    %34 = vector.load %arg10[%c0_23, %c0_24] : memref<1x784xf32, #tpu.memory_space<vmem>>, vector<1x784xf32>
    %35 = vector.broadcast %34 : vector<1x784xf32> to vector<8x784xf32>
    %36 = arith.addf %33, %35 : vector<8x784xf32>
    %37 = arith.negf %36 : vector<8x784xf32>
    %38 = math.exp %37 : vector<8x784xf32>
    %cst_25 = arith.constant 1.000000e+00 : f32
    %39 = vector.broadcast %cst_25 : f32 to vector<8x784xf32>
    %40 = arith.addf %39, %38 : vector<8x784xf32>
    %41 = arith.divf %39, %40 : vector<8x784xf32>
    %c0_26 = arith.constant 0 : index
    %c0_27 = arith.constant 0 : index
    %42 = vector.load %arg11[%c0_26, %c0_27] : memref<8x784xf32, #tpu.memory_space<vmem>>, vector<8x784xf32>
    tpu.vector_store %arg11[%c0_26, %c0_27], %41 {strides = array<i32>} : memref<8x784xf32, #tpu.memory_space<vmem>>, vector<8x784xf32>,
    %c0_28 = arith.constant 0 : index
    %c0_29 = arith.constant 0 : index
    %43 = vector.load %arg12[%c0_28, %c0_29] : memref<8x8xf32, #tpu.memory_space<vmem>>, vector<8x8xf32>
    tpu.vector_store %arg12[%c0_28, %c0_29], %15 {strides = array<i32>} : memref<8x8xf32, #tpu.memory_space<vmem>>, vector<8x8xf32>,
    %c0_30 = arith.constant 0 : index
    %c0_31 = arith.constant 0 : index
    %44 = vector.load %arg13[%c0_30, %c0_31] : memref<8x8xf32, #tpu.memory_space<vmem>>, vector<8x8xf32>
    tpu.vector_store %arg13[%c0_30, %c0_31], %16 {strides = array<i32>} : memref<8x8xf32, #tpu.memory_space<vmem>>, vector<8x8xf32>,
    return
  }
  func.func @transform_0(%arg0: i32) -> (i32, i32) {
    %c0_i32 = arith.constant 0 : i32
    %c0_i32_0 = arith.constant 0 : i32
    return %arg0, %c0_i32 : i32, i32
  }
  func.func @transform_1(%arg0: i32) -> (i32, i32) {
    %c0_i32 = arith.constant 0 : i32
    %c0_i32_0 = arith.constant 0 : i32
    return %arg0, %c0_i32 : i32, i32
  }
  func.func @transform_2(%arg0: i32) -> (i32, i32) {
    %c0_i32 = arith.constant 0 : i32
    %c0_i32_0 = arith.constant 0 : i32
    %c0_i32_1 = arith.constant 0 : i32
    return %c0_i32, %c0_i32_0 : i32, i32
  }
  func.func @transform_3(%arg0: i32) -> (i32, i32) {
    %c0_i32 = arith.constant 0 : i32
    %c0_i32_0 = arith.constant 0 : i32
    %c0_i32_1 = arith.constant 0 : i32
    return %c0_i32, %c0_i32_0 : i32, i32
  }
  func.func @transform_4(%arg0: i32) -> (i32, i32) {
    %c0_i32 = arith.constant 0 : i32
    %c0_i32_0 = arith.constant 0 : i32
    %c0_i32_1 = arith.constant 0 : i32
    return %c0_i32, %c0_i32_0 : i32, i32
  }
  func.func @transform_5(%arg0: i32) -> (i32, i32) {
    %c0_i32 = arith.constant 0 : i32
    %c0_i32_0 = arith.constant 0 : i32
    %c0_i32_1 = arith.constant 0 : i32
    return %c0_i32, %c0_i32_0 : i32, i32
  }
  func.func @transform_6(%arg0: i32) -> (i32, i32) {
    %c0_i32 = arith.constant 0 : i32
    %c0_i32_0 = arith.constant 0 : i32
    %c0_i32_1 = arith.constant 0 : i32
    return %c0_i32, %c0_i32_0 : i32, i32
  }
  func.func @transform_7(%arg0: i32) -> (i32, i32) {
    %c0_i32 = arith.constant 0 : i32
    %c0_i32_0 = arith.constant 0 : i32
    %c0_i32_1 = arith.constant 0 : i32
    return %c0_i32, %c0_i32_0 : i32, i32
  }
  func.func @transform_8(%arg0: i32) -> (i32, i32) {
    %c0_i32 = arith.constant 0 : i32
    %c0_i32_0 = arith.constant 0 : i32
    %c0_i32_1 = arith.constant 0 : i32
    return %c0_i32, %c0_i32_0 : i32, i32
  }
  func.func @transform_9(%arg0: i32) -> (i32, i32) {
    %c0_i32 = arith.constant 0 : i32
    %c0_i32_0 = arith.constant 0 : i32
    %c0_i32_1 = arith.constant 0 : i32
    return %c0_i32, %c0_i32_0 : i32, i32
  }
  func.func @transform_10(%arg0: i32) -> (i32, i32) {
    %c0_i32 = arith.constant 0 : i32
    %c0_i32_0 = arith.constant 0 : i32
    return %arg0, %c0_i32 : i32, i32
  }
  func.func @transform_11(%arg0: i32) -> (i32, i32) {
    %c0_i32 = arith.constant 0 : i32
    %c0_i32_0 = arith.constant 0 : i32
    return %arg0, %c0_i32 : i32, i32
  }
  func.func @transform_12(%arg0: i32) -> (i32, i32) {
    %c0_i32 = arith.constant 0 : i32
    %c0_i32_0 = arith.constant 0 : i32
    return %arg0, %c0_i32 : i32, i32
  }
}

</mosaic_0001>

<bundles_post_ra>
// kernel: vae_forward.1
= control target key start
LH: loop header
LB: loop body
LE: loop exit
PB: predicated region body
PF: predicated region fallthrough
CT: control target
= control target key end

     0   :  { %v3996_v42 = vmov 0   ;;  %vm654_vm0 = vcmask 130048   ;;  %s5232_s0 = inlined_call_operand.vmem [shape: f32[8,784], index: 0, kind: input, shape index: {}]   ;;  %s5233_s1 = inlined_call_operand.vmem [shape: f32[8,8], index: 1, kind: input, shape index: {}]   ;;  %s5234_s2 = inlined_call_operand.vmem [shape: bf16[784,256], index: 2, kind: input, shape index: {}]   ;;  %s5235_s3 = inlined_call_operand.vmem [shape: f32[1,256], index: 3, kind: input, shape index: {}]   ;;  %s5236_s4 = inlined_call_operand.vmem [shape: bf16[256,16], index: 4, kind: input, shape index: {}]   ;;  %s5237_s5 = inlined_call_operand.vmem [shape: f32[1,16], index: 5, kind: input, shape index: {}]   ;;  %s5238_s6 = inlined_call_operand.vmem [shape: bf16[8,512], index: 6, kind: input, shape index: {}]   ;;  %s5239_s7 = inlined_call_operand.vmem [shape: f32[1,512], index: 7, kind: input, shape index: {}]   ;;  %s5240_s8 = inlined_call_operand.vmem [shape: bf16[512,784], index: 8, kind: input, shape index: {}]   ;;  %s5241_s9 = inlined_call_operand.vmem [shape: f32[1,784], index: 9, kind: input, shape index: {}]   ;;  %s5242_s10 = inlined_call_operand.hbm [shape: f32[8,784], index: 10, kind: output, shape index: {0}]   ;;  %s5243_s11 = inlined_call_operand.vmem [shape: f32[8,8], index: 11, kind: output, shape index: {1}]   ;;  %s5244_s12 = inlined_call_operand.vmem [shape: f32[8,8], index: 12, kind: output, shape index: {2}]  }
   0x1   :  { %v3455_v0 = vld [vmem:[%s5234_s2 + $0x4] ss:$8 sps:$4 sm:$0xff]   ;;  %v3457_v1 = vld [vmem:[%s5234_s2] ss:$8 sps:$4 sm:$0xff]   ;;  %v3458_v2 = vld [vmem:[%s5234_s2 + $0x14] ss:$8 sps:$4 sm:$0xff]   ;;  %813 = vmatprep.mubr.bf16.mxu1 %v3996_v42 }
   0x2   :  { %658 = vmatprep.subr.bf16.mxu0 %v3455_v0  ;;  %v3460_v3 = vld [vmem:[%s5234_s2 + $0x10] ss:$8 sps:$4 sm:$0xff]   ;;  %v3461_v4 = vld [vmem:[%s5234_s2 + $0x24] ss:$8 sps:$4 sm:$0xff]   ;;  %v3463_v5 = vld [vmem:[%s5234_s2 + $0x20] ss:$8 sps:$4 sm:$0xff]  }
   0x3   :  { %659 = vmatpush1.bf16.msra.mxu0 %v3457_v1  ;;  %v3464_v6 = vld [vmem:[%s5234_s2 + $0x34] ss:$8 sps:$4 sm:$0xff]   ;;  %v3466_v7 = vld [vmem:[%s5234_s2 + $0x30] ss:$8 sps:$4 sm:$0xff]   ;;  %v3467_v8 = vld [vmem:[%s5234_s2 + $0x44] ss:$8 sps:$4 sm:$0xff]  }
   0x4   :  { %660 = vmatprep.subr.bf16.mxu0 %v3458_v2  ;;  %v3469_v9 = vld [vmem:[%s5234_s2 + $0x40] ss:$8 sps:$4 sm:$0xff]   ;;  %v3470_v10 = vld [vmem:[%s5234_s2 + $0x54] ss:$8 sps:$4 sm:$0xff]   ;;  %v3472_v11 = vld [vmem:[%s5234_s2 + $0x50] ss:$8 sps:$4 sm:$0xff]  }
   0x5   :  { %v3473_v12 = vld [vmem:[%s5234_s2 + $0x64] ss:$8 sps:$4 sm:$0xff]   ;;  %v3475_v15 = vld [vmem:[%s5234_s2 + $0x60] ss:$8 sps:$4 sm:$0xff]   ;;  %v3476_v16 = vld [vmem:[%s5234_s2 + $0x74] ss:$8 sps:$4 sm:$0xff]  }
   0x6   :  { %v41_v13 = vld [vmem:[%s5232_s0 + $0x8] sm:$0xff]  ;;  %v3478_v17 = vld [vmem:[%s5234_s2 + $0x70] ss:$8 sps:$4 sm:$0xff]   ;;  %v3482_v20 = vld [vmem:[%s5234_s2 + $0x94] ss:$8 sps:$4 sm:$0xff]  }
   0x7   :  { %661 = vmatpush1.bf16.msra.mxu0 %v3460_v3  ;;  %v48_v14 = vpack.c.bf16 %v41_v13, %v41_v13  ;;  %v3479_v18 = vld [vmem:[%s5234_s2 + $0x84] ss:$8 sps:$4 sm:$0xff]   ;;  %v3481_v19 = vld [vmem:[%s5234_s2 + $0x80] ss:$8 sps:$4 sm:$0xff]   ;;  %v3484_v21 = vld [vmem:[%s5234_s2 + $0x90] ss:$8 sps:$4 sm:$0xff]  }
   0x8   :  { %662 = vmatprep.subr.bf16.mxu0 %v3461_v4  ;;  %v3485_v22 = vld [vmem:[%s5234_s2 + $0xa4] ss:$8 sps:$4 sm:$0xff]   ;;  %v3487_v23 = vld [vmem:[%s5234_s2 + $0xa0] ss:$8 sps:$4 sm:$0xff]   ;;  %v3488_v24 = vld [vmem:[%s5234_s2 + $0xb4] ss:$8 sps:$4 sm:$0xff]  }
   0x9   :  { %690 = vmatprep.mubr.bf16.mxu0 %v48_v14  ;;  %v3490_v25 = vld [vmem:[%s5234_s2 + $0xb0] ss:$8 sps:$4 sm:$0xff]   ;;  %v3491_v26 = vld [vmem:[%s5234_s2 + $0xc4] ss:$8 sps:$4 sm:$0xff]   ;;  %v3493_v27 = vld [vmem:[%s5234_s2 + $0xc0] ss:$8 sps:$4 sm:$0xff]  }
   0xa   :  { %v3494_v28 = vld [vmem:[%s5234_s2 + $0xd4] ss:$8 sps:$4 sm:$0xff]   ;;  %v3496_v29 = vld [vmem:[%s5234_s2 + $0xd0] ss:$8 sps:$4 sm:$0xff]   ;;  %v3497_v30 = vld [vmem:[%s5234_s2 + $0xe4] ss:$8 sps:$4 sm:$0xff]  }
   0xb   :  { %663 = vmatpush1.bf16.msra.mxu0 %v3463_v5  ;;  %v3499_v31 = vld [vmem:[%s5234_s2 + $0xe0] ss:$8 sps:$4 sm:$0xff]   ;;  %v3500_v32 = vld [vmem:[%s5234_s2 + $0xf4] ss:$8 sps:$4 sm:$0xff]   ;;  %v3502_v33 = vld [vmem:[%s5234_s2 + $0xf0] ss:$8 sps:$4 sm:$0xff]  }
   0xc   :  { %664 = vmatprep.subr.bf16.mxu0 %v3464_v6  ;;  %v3505_v34 = vld [vmem:[%s5234_s2 + $0x104] ss:$8 sps:$4 sm:$0xff]   ;;  %v43_v36 = vld [vmem:[%s5232_s0 + $0x18] sm:$0xff]  ;;  %v3503_v38 = vld [vmem:[%s5234_s2 + $0x100] ss:$8 sps:$4 sm:$0xff]  }
   0xd   :  { %v40_v35 = vld [vmem:[%s5232_s0] sm:$0xff]  ;;  %v3508_v39 = vld [vmem:[%s5234_s2 + $0x114] ss:$8 sps:$4 sm:$0xff]   ;;  %v50_v40 = vpack.c.bf16 %v43_v36, %v43_v36  ;;  %v3506_v43 = vld [vmem:[%s5234_s2 + $0x110] ss:$8 sps:$4 sm:$0xff]  }
   0xe   :  { %v47_v37 = vpack.c.bf16 %v40_v35, %v40_v35  ;;  %v3596_v41 = vld [vmem:[%s5234_s2 + $0x304] ss:$8 sps:$4 sm:$0xff]   ;;  %v3601_v44 = vld [vmem:[%s5234_s2 + $0x300] ss:$8 sps:$4 sm:$0xff]   ;;  %v46_v46 = vld [vmem:[%s5232_s0 + $0x30] sm:$0xff] }
   0xf   :  { %665 = vmatpush1.bf16.msra.mxu0 %v3466_v7  ;;  %781 = vmatprep.subr.bf16.mxu1 %v3596_v41  ;;  %v3511_v45 = vld [vmem:[%s5234_s2 + $0x124] ss:$8 sps:$4 sm:$0xff]   ;;  %v53_v47 = vpack.c.bf16 %v46_v46, %v46_v46  ;;  %v3509_v49 = vld [vmem:[%s5234_s2 + $0x120] ss:$8 sps:$4 sm:$0xff]   ;;  %v3514_v52 = vld [vmem:[%s5234_s2 + $0x134] ss:$8 sps:$4 sm:$0xff]  }
  0x10   :  { %666 = vmatprep.subr.bf16.mxu0 %v3467_v8  ;;  %782 = vmatpush1.bf16.msra.mxu1 %v3601_v44  ;;  %v3602_v48 = vld [vmem:[%s5236_s4 + $0x40] sm:$0xff]   ;;  %v3604_v51 = vld [vmem:[%s5236_s4 + $0x48] sm:$0xff]   ;;  %v3606_v54 = vld [vmem:[%s5236_s4 + $0x50] sm:$0xff]  }
  0x11   :  { %v3603_v50 = vld [vmem:[%s5236_s4] sm:$0xff]   ;;  %3356 = vmatprep.subr.bf16.mxu1 %v3602_v48  ;;  %v3605_v53 = vld [vmem:[%s5236_s4 + $0x8] sm:$0xff]   ;;  %v3512_v55 = vld [vmem:[%s5234_s2 + $0x130] ss:$8 sps:$4 sm:$0xff]  }
  0x12   :  { %v3517_v56 = vld [vmem:[%s5234_s2 + $0x144] ss:$8 sps:$4 sm:$0xff]   ;;  %v3607_v57 = vld [vmem:[%s5236_s4 + $0x10] sm:$0xff]   ;;  %v3515_v58 = vld [vmem:[%s5234_s2 + $0x140] ss:$8 sps:$4 sm:$0xff]  }
  0x13   :  { %667 = vmatpush1.bf16.msra.mxu0 %v3469_v9  ;;  %3099 = vmatmul.mubr.msk.bf16.vlgmr.msra.gmra.mrb[0].mxu1 %vm654_vm0, %v53_v47  ;;  %v3608_v59 = vld [vmem:[%s5236_s4 + $0x58] sm:$0xff]   ;;  %v3610_v62 = vld [vmem:[%s5236_s4 + $0x60] sm:$0xff]  }
  0x14   :  { %668 = vmatprep.subr.bf16.mxu0 %v3470_v10  ;;  %3357 = vmatpush3.bf16.msra.mxu1 %v3603_v50  ;;  %v3520_v60 = vld [vmem:[%s5234_s2 + $0x154] ss:$8 sps:$4 sm:$0xff]   ;;  %v3518_v63 = vld [vmem:[%s5234_s2 + $0x150] ss:$8 sps:$4 sm:$0xff]   ;;  %v3523_v0 = vld [vmem:[%s5234_s2 + $0x164] ss:$8 sps:$4 sm:$0xff]  }
  0x15   :  { %3358 = vmatprep.subr.bf16.mxu1 %v3604_v51  ;;  %v3609_v61 = vld [vmem:[%s5236_s4 + $0x18] sm:$0xff]   ;;  %v3611_v1 = vld [vmem:[%s5236_s4 + $0x20] sm:$0xff]  }
  0x16   :  { %v3521_v2 = vld [vmem:[%s5234_s2 + $0x160] ss:$8 sps:$4 sm:$0xff]   ;;  %v3526_v3 = vld [vmem:[%s5234_s2 + $0x174] ss:$8 sps:$4 sm:$0xff]   ;;  %v3524_v4 = vld [vmem:[%s5234_s2 + $0x170] ss:$8 sps:$4 sm:$0xff]  }
  0x17   :  { %669 = vmatpush1.bf16.msra.mxu0 %v3472_v11  ;;  %v3529_v5 = vld [vmem:[%s5234_s2 + $0x184] ss:$8 sps:$4 sm:$0xff]   ;;  %v3527_v6 = vld [vmem:[%s5234_s2 + $0x180] ss:$8 sps:$4 sm:$0xff]   ;;  %v3532_v7 = vld [vmem:[%s5234_s2 + $0x194] ss:$8 sps:$4 sm:$0xff]  }
  0x18   :  { %670 = vmatprep.subr.bf16.mxu0 %v3473_v12  ;;  %3359 = vmatpush3.bf16.msra.mxu1 %v3605_v53  ;;  %v3530_v8 = vld [vmem:[%s5234_s2 + $0x190] ss:$8 sps:$4 sm:$0xff]   ;;  %v3535_v9 = vld [vmem:[%s5234_s2 + $0x1a4] ss:$8 sps:$4 sm:$0xff]   ;;  %v3533_v10 = vld [vmem:[%s5234_s2 + $0x1a0] ss:$8 sps:$4 sm:$0xff]  }
  0x19   :  { %3360 = vmatprep.subr.bf16.mxu1 %v3606_v54  ;;  %v3538_v11 = vld [vmem:[%s5234_s2 + $0x1b4] ss:$8 sps:$4 sm:$0xff]   ;;  %v3536_v12 = vld [vmem:[%s5234_s2 + $0x1b0] ss:$8 sps:$4 sm:$0xff]   ;;  %v3541_v13 = vld [vmem:[%s5234_s2 + $0x1c4] ss:$8 sps:$4 sm:$0xff]  }
  0x1a   :  { %v3539_v14 = vld [vmem:[%s5234_s2 + $0x1c0] ss:$8 sps:$4 sm:$0xff]   ;;  %v3568_v35 = vld [vmem:[%s5234_s2 + $0x254] ss:$8 sps:$4 sm:$0xff]   ;;  %v3566_v36 = vld [vmem:[%s5234_s2 + $0x250] ss:$8 sps:$4 sm:$0xff]  }
  0x1b   :  { %671 = vmatpush1.bf16.msra.mxu0 %v3475_v15  ;;  %v3544_v15 = vld [vmem:[%s5234_s2 + $0x1d4] ss:$8 sps:$4 sm:$0xff]   ;;  %v3577_v41 = vld [vmem:[%s5234_s2 + $0x284] ss:$8 sps:$4 sm:$0xff]   ;;  %v3575_v44 = vld [vmem:[%s5234_s2 + $0x280] ss:$8 sps:$4 sm:$0xff]  }
  0x1c   :  { %672 = vmatprep.subr.bf16.mxu0 %v3476_v16  ;;  %3361 = vmatpush3.bf16.msra.mxu1 %v3607_v57  ;;  %v3542_v16 = vld [vmem:[%s5234_s2 + $0x1d0] ss:$8 sps:$4 sm:$0xff]   ;;  %v3583_v47 = vld [vmem:[%s5234_s2 + $0x2a4] ss:$8 sps:$4 sm:$0xff]   ;;  %v3581_v48 = vld [vmem:[%s5234_s2 + $0x2a0] ss:$8 sps:$4 sm:$0xff]  }
  0x1d   :  { %3362 = vmatprep.subr.bf16.mxu1 %v3608_v59  ;;  %v3578_v46 = vld [vmem:[%s5234_s2 + $0x290] ss:$8 sps:$4 sm:$0xff]  }
  0x1f   :  { %673 = vmatpush1.bf16.msra.mxu0 %v3478_v17  ;;  %v3547_v17 = vld [vmem:[%s5234_s2 + $0x1e4] ss:$8 sps:$4 sm:$0xff]  }
  0x20   :  { %674 = vmatprep.subr.bf16.mxu0 %v3479_v18  ;;  %3363 = vmatpush3.bf16.msra.mxu1 %v3609_v61  ;;  %v3545_v18 = vld [vmem:[%s5234_s2 + $0x1e0] ss:$8 sps:$4 sm:$0xff]  }
  0x21   :  { %3364 = vmatprep.subr.bf16.mxu1 %v3610_v62 }
  0x23   :  { %675 = vmatpush1.bf16.msra.mxu0 %v3481_v19  ;;  %v3550_v19 = vld [vmem:[%s5234_s2 + $0x1f4] ss:$8 sps:$4 sm:$0xff]  }
  0x24   :  { %676 = vmatprep.subr.bf16.mxu0 %v3482_v20  ;;  %3365 = vmatpush3.bf16.msra.mxu1 %v3611_v1  ;;  %v3548_v20 = vld [vmem:[%s5234_s2 + $0x1f0] ss:$8 sps:$4 sm:$0xff]  }
  0x27   :  { %677 = vmatpush1.bf16.msra.mxu0 %v3484_v21  ;;  %v42_v21 = vld [vmem:[%s5232_s0 + $0x10] sm:$0xff] }
  0x28   :  { %678 = vmatprep.subr.bf16.mxu0 %v3485_v22  ;;  %v3553_v22 = vld [vmem:[%s5234_s2 + $0x204] ss:$8 sps:$4 sm:$0xff]  }
  0x2b   :  { %679 = vmatpush1.bf16.msra.mxu0 %v3487_v23  ;;  %v45_v23 = vld [vmem:[%s5232_s0 + $0x28] sm:$0xff] }
  0x2c   :  { %680 = vmatprep.subr.bf16.mxu0 %v3488_v24  ;;  %v3551_v24 = vld [vmem:[%s5234_s2 + $0x200] ss:$8 sps:$4 sm:$0xff]  }
  0x2f   :  { %681 = vmatpush1.bf16.msra.mxu0 %v3490_v25  ;;  %v49_v25 = vpack.c.bf16 %v42_v21, %v42_v21 }
  0x30   :  { %682 = vmatprep.subr.bf16.mxu0 %v3491_v26  ;;  %v3556_v26 = vld [vmem:[%s5234_s2 + $0x214] ss:$8 sps:$4 sm:$0xff]  }
  0x33   :  { %683 = vmatpush1.bf16.msra.mxu0 %v3493_v27  ;;  %v52_v27 = vpack.c.bf16 %v45_v23, %v45_v23 }
  0x34   :  { %684 = vmatprep.subr.bf16.mxu0 %v3494_v28  ;;  %v3554_v28 = vld [vmem:[%s5234_s2 + $0x210] ss:$8 sps:$4 sm:$0xff]  }
  0x37   :  { %685 = vmatpush1.bf16.msra.mxu0 %v3496_v29  ;;  %v3559_v29 = vld [vmem:[%s5234_s2 + $0x224] ss:$8 sps:$4 sm:$0xff]  }
  0x38   :  { %686 = vmatprep.subr.bf16.mxu0 %v3497_v30  ;;  %v3557_v30 = vld [vmem:[%s5234_s2 + $0x220] ss:$8 sps:$4 sm:$0xff]  }
  0x3b   :  { %687 = vmatpush1.bf16.msra.mxu0 %v3499_v31  ;;  %v3562_v31 = vld [vmem:[%s5234_s2 + $0x234] ss:$8 sps:$4 sm:$0xff]  }
  0x3c   :  { %688 = vmatprep.subr.bf16.mxu0 %v3500_v32  ;;  %v3560_v32 = vld [vmem:[%s5234_s2 + $0x230] ss:$8 sps:$4 sm:$0xff]  }
  0x3f   :  { %689 = vmatpush1.bf16.msra.mxu0 %v3502_v33  ;;  %v3565_v33 = vld [vmem:[%s5234_s2 + $0x244] ss:$8 sps:$4 sm:$0xff]  }
  0x40   :  { %699 = vmatprep.subr.bf16.mxu0 %v3505_v34  ;;  %v3563_v34 = vld [vmem:[%s5234_s2 + $0x240] ss:$8 sps:$4 sm:$0xff]  }
  0x42   :  { %691 = vmatmul.mubr.bf16.vlgmr.msra.gmra.mrb[0].mxu0 %v47_v37  ;;  %v3571_v37 = vld [vmem:[%s5234_s2 + $0x264] ss:$8 sps:$4 sm:$0xff]  }
  0x43   :  { %700 = vmatpush1.bf16.msra.mxu0 %v3503_v38  ;;  %731 = vmatprep.mubr.bf16.mxu0 %v50_v40  ;;  %v3569_v38 = vld [vmem:[%s5234_s2 + $0x260] ss:$8 sps:$4 sm:$0xff]   ;;  %v3572_v40 = vld [vmem:[%s5234_s2 + $0x270] ss:$8 sps:$4 sm:$0xff]  }
  0x44   :  { %701 = vmatprep.subr.bf16.mxu0 %v3508_v39  ;;  %v3574_v39 = vld [vmem:[%s5234_s2 + $0x274] ss:$8 sps:$4 sm:$0xff]  }
  0x47   :  { %702 = vmatpush1.bf16.msra.mxu0 %v3506_v43  ;;  %v3612_v43 = vld [vmem:[%s5236_s4 + $0x68] sm:$0xff]  }
  0x48   :  { %703 = vmatprep.subr.bf16.mxu0 %v3511_v45  ;;  %3366 = vmatprep.subr.bf16.mxu1 %v3612_v43  ;;  %v3580_v45 = vld [vmem:[%s5234_s2 + $0x294] ss:$8 sps:$4 sm:$0xff]  }
  0x4b   :  { %704 = vmatpush1.bf16.msra.mxu0 %v3509_v49  ;;  %v3586_v49 = vld [vmem:[%s5234_s2 + $0x2b4] ss:$8 sps:$4 sm:$0xff]  }
  0x4c   :  { %705 = vmatprep.subr.bf16.mxu0 %v3514_v52 }
  0x4f   :  { %706 = vmatpush1.bf16.msra.mxu0 %v3512_v55 }
  0x50   :  { %707 = vmatprep.subr.bf16.mxu0 %v3517_v56 }
  0x53   :  { %708 = vmatpush1.bf16.msra.mxu0 %v3515_v58 }
  0x54   :  { %709 = vmatprep.subr.bf16.mxu0 %v3520_v60 }
  0x57   :  { %710 = vmatpush1.bf16.msra.mxu0 %v3518_v63 }
  0x58   :  { %711 = vmatprep.subr.bf16.mxu0 %v3523_v0 }
  0x5b   :  { %712 = vmatpush1.bf16.msra.mxu0 %v3521_v2 }
  0x5c   :  { %713 = vmatprep.subr.bf16.mxu0 %v3526_v3 }
  0x5f   :  { %714 = vmatpush1.bf16.msra.mxu0 %v3524_v4 }
  0x60   :  { %715 = vmatprep.subr.bf16.mxu0 %v3529_v5 }
  0x63   :  { %716 = vmatpush1.bf16.msra.mxu0 %v3527_v6 }
  0x64   :  { %717 = vmatprep.subr.bf16.mxu0 %v3532_v7 }
  0x67   :  { %718 = vmatpush1.bf16.msra.mxu0 %v3530_v8 }
  0x68   :  { %719 = vmatprep.subr.bf16.mxu0 %v3535_v9 }
  0x6b   :  { %720 = vmatpush1.bf16.msra.mxu0 %v3533_v10 }
  0x6c   :  { %721 = vmatprep.subr.bf16.mxu0 %v3538_v11 }
  0x6f   :  { %722 = vmatpush1.bf16.msra.mxu0 %v3536_v12 }
  0x70   :  { %723 = vmatprep.subr.bf16.mxu0 %v3541_v13 }
  0x73   :  { %724 = vmatpush1.bf16.msra.mxu0 %v3539_v14 }
  0x74   :  { %725 = vmatprep.subr.bf16.mxu0 %v3544_v15 }
  0x77   :  { %726 = vmatpush1.bf16.msra.mxu0 %v3542_v16 }
  0x78   :  { %727 = vmatprep.subr.bf16.mxu0 %v3547_v17 }
  0x7b   :  { %728 = vmatpush1.bf16.msra.mxu0 %v3545_v18 }
  0x7c   :  { %729 = vmatprep.subr.bf16.mxu0 %v3550_v19 }
  0x7f   :  { %730 = vmatpush1.bf16.msra.mxu0 %v3548_v20 }
  0x80   :  { %740 = vmatprep.subr.bf16.mxu0 %v3553_v22 }
  0x82   :  { %732 = vmatmul.mubr.bf16.vlgmr.msra.gmra.mrb[0].mxu0 %v49_v25 }
  0x83   :  { %741 = vmatpush1.bf16.msra.mxu0 %v3551_v24  ;;  %772 = vmatprep.mubr.bf16.mxu0 %v52_v27 }
  0x84   :  { %742 = vmatprep.subr.bf16.mxu0 %v3556_v26 }
  0x87   :  { %743 = vmatpush1.bf16.msra.mxu0 %v3554_v28 }
  0x88   :  { %744 = vmatprep.subr.bf16.mxu0 %v3559_v29 }
  0x8b   :  { %745 = vmatpush1.bf16.msra.mxu0 %v3557_v30 }
  0x8c   :  { %746 = vmatprep.subr.bf16.mxu0 %v3562_v31 }
  0x8f   :  { %747 = vmatpush1.bf16.msra.mxu0 %v3560_v32 }
  0x90   :  { %748 = vmatprep.subr.bf16.mxu0 %v3565_v33 }
  0x93   :  { %749 = vmatpush1.bf16.msra.mxu0 %v3563_v34 }
  0x94   :  { %750 = vmatprep.subr.bf16.mxu0 %v3568_v35 }
  0x97   :  { %751 = vmatpush1.bf16.msra.mxu0 %v3566_v36 }
  0x98   :  { %752 = vmatprep.subr.bf16.mxu0 %v3571_v37 }
  0x9b   :  { %753 = vmatpush1.bf16.msra.mxu0 %v3569_v38 }
  0x9c   :  { %754 = vmatprep.subr.bf16.mxu0 %v3574_v39 }
  0x9f   :  { %755 = vmatpush1.bf16.msra.mxu0 %v3572_v40 }
  0xa0   :  { %756 = vmatprep.subr.bf16.mxu0 %v3577_v41 }
  0xa3   :  { %757 = vmatpush1.bf16.msra.mxu0 %v3575_v44 }
  0xa4   :  { %758 = vmatprep.subr.bf16.mxu0 %v3580_v45 }
  0xa7   :  { %759 = vmatpush1.bf16.msra.mxu0 %v3578_v46 }
  0xa8   :  { %760 = vmatprep.subr.bf16.mxu0 %v3583_v47 }
  0xa9   :  { %18 = vsyncpa [#allocation3], 0  ;;  %v3584_v50 = vld [vmem:[%s5234_s2 + $0x2b0] ss:$8 sps:$4 sm:$0xff]   ;;  %v3589_v51 = vld [vmem:[%s5234_s2 + $0x2c4] ss:$8 sps:$4 sm:$0xff]   ;;  %v154_v6 = vlaneseq }
  0xaa   :  { %v3587_v52 = vld [vmem:[%s5234_s2 + $0x2c0] ss:$8 sps:$4 sm:$0xff]   ;;  %v3592_v53 = vld [vmem:[%s5234_s2 + $0x2d4] ss:$8 sps:$4 sm:$0xff]   ;;  %v3590_v54 = vld [vmem:[%s5234_s2 + $0x2d0] ss:$8 sps:$4 sm:$0xff]  }
  0xab   :  { %761 = vmatpush1.bf16.msra.mxu0 %v3581_v48  ;;  %v3595_v55 = vld [vmem:[%s5234_s2 + $0x2e4] ss:$8 sps:$4 sm:$0xff]   ;;  %v3593_v56 = vld [vmem:[%s5234_s2 + $0x2e0] ss:$8 sps:$4 sm:$0xff]   ;;  %v3600_v57 = vld [vmem:[%s5234_s2 + $0x2f4] ss:$8 sps:$4 sm:$0xff]  }
  0xac   :  { %762 = vmatprep.subr.bf16.mxu0 %v3586_v49  ;;  %v3598_v58 = vld [vmem:[%s5234_s2 + $0x2f0] ss:$8 sps:$4 sm:$0xff]   ;;  %v44_v59 = vld [vmem:[%s5232_s0 + $0x20] sm:$0xff]  ;;  %v3613_v61 = vld [vmem:[%s5236_s4 + $0x28] sm:$0xff]   ;;  %v4429_v7 = vshrl.u32 %v154_v6, 7  ;;  %vm1050_vm1 = vcmask 1043456  }
  0xad   :  { %v51_v60 = vpack.c.bf16 %v44_v59, %v44_v59  ;;  %3367 = vmatpush3.bf16.msra.mxu1 %v3613_v61  ;;  %v3614_v62 = vld [vmem:[%s5236_s4 + $0x70] sm:$0xff]   ;;  %v3616_v1 = vld [vmem:[%s5236_s4 + $0x78] sm:$0xff]   ;;  %v152_v9 = vld [vmem:[%s5235_s3] sm:$0x3]  ;;  %vm1046_vm2 = vcmask 64512  }
  0xae   :  { %v3615_v63 = vld [vmem:[%s5236_s4 + $0x30] sm:$0xff]   ;;  %3368 = vmatprep.subr.bf16.mxu1 %v3614_v62  ;;  %v3617_v3 = vld [vmem:[%s5236_s4 + $0x38] sm:$0xff]   ;;  %v4432_v8 = vsub.s32 0, %v4429_v7  ;;  %v4438_v10 = vsub.s32 1, %v4429_v7  ;;  %v1012_v25 = vld [vmem:[%s5238_s6] sm:$0xff] }
  0xaf   :  { %763 = vmatpush1.bf16.msra.mxu0 %v3584_v50  ;;  %v3118_v26 = vcombine.high %v1012_v25, %v1012_v25  ;;  %v3117_v27 = vcombine.low %v1012_v25, %v1012_v25  ;;  %v3100_v30 = vld [vmem:[%s5237_s5] ss:$0 sm:$0xff]  ;;  %v4462_v38 = vld [vmem:[%s5238_s6 + $0x8] sm:$0xff]  ;;  %s3997_s5 = smov 120   ;;  %v3627_v43 = vld [vmem:[%s5240_s8 + $0x14] ss:$28 sps:$4 sm:$0xff]  }
  0xb0   :  { %764 = vmatprep.subr.bf16.mxu0 %v3589_v51  ;;  %v157_v11 = vrot.slane %v152_v9, %v4432_v8  ;;  %v161_v12 = vrot.slane %v152_v9, %v4438_v10  ;;  %v3120_v39 = vcombine.high %v4462_v38, %v4462_v38  ;;  %v3625_v41 = vld [vmem:[%s5240_s8 + $0x10] ss:$28 sps:$4 sm:$0xff]   ;;  %v3631_v45 = vld [vmem:[%s5240_s8 + $0x48] ss:$28 sps:$4 sm:$0xff]   ;;  %v3637_v47 = vld [vmem:[%s5240_s8 + $0x80] ss:$28 sps:$4 sm:$0xff]  }
  0xb1   :  { %3369 = vmatpush3.bf16.msra.mxu1 %v3615_v63  ;;  %v1052_v28 = vsel %vm1050_vm1, %v3117_v27, 0  ;;  %v3633_v44 = vld [vmem:[%s5240_s8 + $0x4c] ss:$28 sps:$4 sm:$0xff]   ;;  %v3639_v46 = vld [vmem:[%s5240_s8 + $0x84] ss:$28 sps:$4 sm:$0xff]  }
  0xb2   :  { %3370 = vmatprep.subr.bf16.mxu1 %v3616_v1  ;;  %v3645_v48 = vld [vmem:[%s5240_s8 + $0xbc] ss:$28 sps:$4 sm:$0xff]   ;;  %v3651_v50 = vld [vmem:[%s5240_s8 + $0xf4] ss:$28 sps:$4 sm:$0xff]   ;;  %v3679_v61 = vld [vmem:[%s5240_s8 + $0x208] ss:$28 sps:$4 sm:$0xff]  }
  0xb3   :  { %765 = vmatpush1.bf16.msra.mxu0 %v3587_v52  ;;  %v3643_v49 = vld [vmem:[%s5240_s8 + $0xb8] ss:$28 sps:$4 sm:$0xff]   ;;  %v3649_v51 = vld [vmem:[%s5240_s8 + $0xf0] ss:$28 sps:$4 sm:$0xff]   ;;  %v3687_v62 = vld [vmem:[%s5240_s8 + $0x244] ss:$28 sps:$4 sm:$0xff]  }
  0xb4   :  { %766 = vmatprep.subr.bf16.mxu0 %v3592_v53  ;;  %v3657_v52 = vld [vmem:[%s5240_s8 + $0x12c] ss:$28 sps:$4 sm:$0xff]   ;;  %v3685_v63 = vld [vmem:[%s5240_s8 + $0x240] ss:$28 sps:$4 sm:$0xff]   ;;  %v3691_v1 = vld [vmem:[%s5240_s8 + $0x278] ss:$28 sps:$4 sm:$0xff]  }
  0xb5   :  { %3371 = vmatpush3.bf16.msra.mxu1 %v3617_v3  ;;  %v3655_v53 = vld [vmem:[%s5240_s8 + $0x128] ss:$28 sps:$4 sm:$0xff]   ;;  %v3673_v59 = vld [vmem:[%s5240_s8 + $0x1d0] ss:$28 sps:$4 sm:$0xff]   ;;  %v3646_v25 = vld [vmem:[%s5240_s8 + $0xe0] ss:$28 sps:$4 sm:$0xff]  }
  0xb6   :  { %3121 = vmatprep.subr.msk.bf16.mxu1 %vm1050_vm1, %v3118_v26  ;;  %v3697_v3 = vld [vmem:[%s5240_s8 + $0x2b0] ss:$28 sps:$4 sm:$0xff]   ;;  %v1004_v6 = vld [vmem:[%s5233_s1] sm:$0xff]  ;;  %v3654_v26 = vld [vmem:[%s5240_s8 + $0x11c] ss:$28 sps:$4 sm:$0xff]  }
  0xb7   :  { %767 = vmatpush1.bf16.msra.mxu0 %v3590_v54  ;;  %v3663_v54 = vld [vmem:[%s5240_s8 + $0x164] ss:$28 sps:$4 sm:$0xff]   ;;  %v3652_v27 = vld [vmem:[%s5240_s8 + $0x118] ss:$28 sps:$4 sm:$0xff]  }
  0xb8   :  { %768 = vmatprep.subr.bf16.mxu0 %v3595_v55  ;;  %v3661_v55 = vld [vmem:[%s5240_s8 + $0x160] ss:$28 sps:$4 sm:$0xff]  }
  0xbb   :  { %769 = vmatpush1.bf16.msra.mxu0 %v3593_v56  ;;  %v3669_v56 = vld [vmem:[%s5240_s8 + $0x19c] ss:$28 sps:$4 sm:$0xff]  }
  0xbc   :  { %770 = vmatprep.subr.bf16.mxu0 %v3600_v57  ;;  %v3667_v57 = vld [vmem:[%s5240_s8 + $0x198] ss:$28 sps:$4 sm:$0xff]  }
  0xbf   :  { %771 = vmatpush1.bf16.msra.mxu0 %v3598_v58  ;;  %v3675_v58 = vld [vmem:[%s5240_s8 + $0x1d4] ss:$28 sps:$4 sm:$0xff]  }
  0xc0   :  { %2762 = vmatprep.subr.bf16.mxu0 %v3627_v43  ;;  %v3702_v43 = vld [vmem:[%s5240_s8 + $0x2dc] ss:$28 sps:$4 sm:$0xff]  }
  0xc2   :  { %773 = vmatmul.mubr.bf16.vlgmr.msra.gmra.mrb[0].mxu0 %v51_v60  ;;  %v3681_v60 = vld [vmem:[%s5240_s8 + $0x20c] ss:$28 sps:$4 sm:$0xff]  }
  0xc3   :  { %2763 = vmatpush1.bf16.msra.mxu0 %v3625_v41  ;;  %v3694_v41 = vld [vmem:[%s5240_s8 + $0x2a0] ss:$28 sps:$4 sm:$0xff]  }
  0xc4   :  { %2764 = vmatprep.subr.bf16.mxu0 %v3633_v44  ;;  %v3700_v44 = vld [vmem:[%s5240_s8 + $0x2d8] ss:$28 sps:$4 sm:$0xff]  }
  0xc7   :  { %2765 = vmatpush1.bf16.msra.mxu0 %v3631_v45  ;;  %v3708_v45 = vld [vmem:[%s5240_s8 + $0x314] ss:$28 sps:$4 sm:$0xff]  }
  0xc8   :  { %2766 = vmatprep.subr.bf16.mxu0 %v3639_v46  ;;  %v3711_v46 = vld [vmem:[%s5240_s8 + $0x324] ss:$28 sps:$4 sm:$0xff]  }
  0xcb   :  { %2767 = vmatpush1.bf16.msra.mxu0 %v3637_v47  ;;  %v3706_v47 = vld [vmem:[%s5240_s8 + $0x310] ss:$28 sps:$4 sm:$0xff]  }
  0xcc   :  { %2768 = vmatprep.subr.bf16.mxu0 %v3645_v48  ;;  %v3709_v48 = vld [vmem:[%s5240_s8 + $0x320] ss:$28 sps:$4 sm:$0xff]  }
  0xcf   :  { %2769 = vmatpush1.bf16.msra.mxu0 %v3643_v49  ;;  %v3714_v49 = vld [vmem:[%s5240_s8 + $0x34c] ss:$28 sps:$4 sm:$0xff]  }
  0xd0   :  { %2770 = vmatprep.subr.bf16.mxu0 %v3651_v50  ;;  %v3717_v50 = vld [vmem:[%s5240_s8 + $0x35c] ss:$28 sps:$4 sm:$0xff]  }
  0xd3   :  { %2771 = vmatpush1.bf16.msra.mxu0 %v3649_v51  ;;  %v3712_v51 = vld [vmem:[%s5240_s8 + $0x348] ss:$28 sps:$4 sm:$0xff]  }
  0xd4   :  { %2772 = vmatprep.subr.bf16.mxu0 %v3657_v52  ;;  %v3715_v52 = vld [vmem:[%s5240_s8 + $0x358] ss:$28 sps:$4 sm:$0xff]  }
  0xd7   :  { %2773 = vmatpush1.bf16.msra.mxu0 %v3655_v53  ;;  %v3720_v53 = vld [vmem:[%s5240_s8 + $0x384] ss:$28 sps:$4 sm:$0xff]  }
  0xd8   :  { %2774 = vmatprep.subr.bf16.mxu0 %v3663_v54  ;;  %v3723_v54 = vld [vmem:[%s5240_s8 + $0x394] ss:$28 sps:$4 sm:$0xff]  }
  0xdb   :  { %2775 = vmatpush1.bf16.msra.mxu0 %v3661_v55  ;;  %v4683_v55 = vld [vmem:[%s5239_s7] sm:$0xf] }
  0xdc   :  { %2776 = vmatprep.subr.bf16.mxu0 %v3669_v56  ;;  %v1019_v56 = vrot.slane %v4683_v55, %v4432_v8 }
  0xdf   :  { %2777 = vmatpush1.bf16.msra.mxu0 %v3667_v57  ;;  %v1023_v57 = vrot.slane %v4683_v55, %v4438_v10 }
  0xe0   :  { %2778 = vmatprep.subr.bf16.mxu0 %v3675_v58 }
  0xe3   :  { %2779 = vmatpush1.bf16.msra.mxu0 %v3673_v59 }
  0xe4   :  { %2780 = vmatprep.subr.bf16.mxu0 %v3681_v60 }
  0xe6   :  { %v815_v0 = vpop.f32.mrb[0].mxu1 }
  0xe7   :  { %v817_v2 = vpop.f32.mrb[1].mxu1  ;;  %2781 = vmatpush1.bf16.msra.mxu0 %v3679_v61 }
  0xe8   :  { %v819_v4 = vpop.f32.mrb[2].mxu1  ;;  %2782 = vmatprep.subr.bf16.mxu0 %v3687_v62 }
  0xe9   :  { %v820_v5 = vpop.f32.mrb[3].mxu1  ;;  %v3705_v4 = vld [vmem:[%s5240_s8 + $0x2ec] ss:$28 sps:$4 sm:$0xff]  }
  0xea   :  { %v3703_v5 = vld [vmem:[%s5240_s8 + $0x2e8] ss:$28 sps:$4 sm:$0xff]  }
  0xeb   :  { %2783 = vmatpush1.bf16.msra.mxu0 %v3685_v63  ;;  %v1030_v63 = vsub.s32 3, %v4429_v7 }
 0x195   :  { %v774_v13 = vpop.f32.mrb[0].mxu0 }
 0x196   :  { %v3422_v14 = vadd.f32 %v774_v13, %v157_v11  ;;  %v776_v15 = vpop.f32.mrb[1].mxu0 }
 0x197   :  { %v3424_v16 = vadd.f32 %v776_v15, %v161_v12  ;;  %v778_v17 = vpop.f32.mrb[2].mxu0  ;;  %v3119_v12 = vcombine.low %v4462_v38, %v4462_v38  ;;  %v3690_v38 = vld [vmem:[%s5240_s8 + $0x26c] ss:$28 sps:$4 sm:$0xff]  }
 0x198   :  { %v3423_v18 = vadd.f32 %v3422_v14, %v815_v0  ;;  %v779_v19 = vpop.f32.mrb[3].mxu0  ;;  %v3693_v0 = vld [vmem:[%s5240_s8 + $0x27c] ss:$28 sps:$4 sm:$0xff]   ;;  %v3624_v17 = vld [vmem:[%s5240_s8 + $0x4] ss:$28 sps:$4 sm:$0xff]  }
 0x199   :  { %v3425_v20 = vadd.f32 %v3424_v16, %v817_v2  ;;  %2784 = vmatprep.subr.bf16.mxu0 %v3693_v0  ;;  %v3699_v2 = vld [vmem:[%s5240_s8 + $0x2b4] ss:$28 sps:$4 sm:$0xff]   ;;  %v1058_v16 = vsel %vm1050_vm1, %v3119_v12, 0  ;;  %v3630_v19 = vld [vmem:[%s5240_s8 + $0x3c] ss:$28 sps:$4 sm:$0xff]  }
 0x19a   :  { %v822_v21 = vmax.f32 %v3423_v18, 0.0  ;;  %2785 = vmatpush1.bf16.msra.mxu0 %v3691_v1  ;;  %v3622_v18 = vld [vmem:[%s5240_s8] ss:$28 sps:$4 sm:$0xff]   ;;  %v3729_v12 = vld [vmem:[%s5240_s8 + $0x3cc] ss:$28 sps:$4 sm:$0xff]  }
 0x19b   :  { %v823_v22 = vmax.f32 %v3425_v20, 0.0  ;;  %2786 = vmatprep.subr.bf16.mxu0 %v3699_v2  ;;  %v3628_v20 = vld [vmem:[%s5240_s8 + $0x38] ss:$28 sps:$4 sm:$0xff]  }
 0x19c   :  { %v824_v24 = vpack.c.bf16 %v822_v21, %v822_v21  ;;  %v3634_v21 = vld [vmem:[%s5240_s8 + $0x70] ss:$28 sps:$4 sm:$0xff]  }
 0x19d   :  { %v825_v23 = vpack.c.bf16 %v823_v22, %v823_v22  ;;  %v3642_v22 = vld [vmem:[%s5240_s8 + $0xac] ss:$28 sps:$4 sm:$0xff]  }
 0x19e   :  { %2787 = vmatpush1.bf16.msra.mxu0 %v3697_v3 }
 0x19f   :  { %993 = vmatprep.mubr.bf16.mxu1 %v825_v23  ;;  %2788 = vmatprep.subr.bf16.mxu0 %v3705_v4  ;;  %v3640_v23 = vld [vmem:[%s5240_s8 + $0xa8] ss:$28 sps:$4 sm:$0xff]   ;;  %v3718_v4 = vld [vmem:[%s5240_s8 + $0x380] ss:$28 sps:$4 sm:$0xff]  }
 0x1a0   :  { %994 = vmatmul.mubr.bf16.vlgmr.msra.gmra.mrb[4].mxu1 %v824_v24  ;;  %v3648_v24 = vld [vmem:[%s5240_s8 + $0xe4] ss:$28 sps:$4 sm:$0xff]  }
 0x1a1   :  { %1095 = vmatprep.mubr.bf16.mxu1 %v3996_v42  ;;  %1064 = vmatpush1.bf16.msra.mxu1 %v1052_v28  ;;  %v3660_v28 = vld [vmem:[%s5240_s8 + $0x154] ss:$28 sps:$4 sm:$0xff]  }
 0x1a2   :  { %3123 = vmatprep.subr.msk.bf16.mxu1 %vm1050_vm1, %v3120_v39  ;;  %2789 = vmatpush1.bf16.msra.mxu0 %v3703_v5  ;;  %v3688_v39 = vld [vmem:[%s5240_s8 + $0x268] ss:$28 sps:$4 sm:$0xff]   ;;  %v3721_v5 = vld [vmem:[%s5240_s8 + $0x390] ss:$28 sps:$4 sm:$0xff]  }
 0x1a3   :  { %2790 = vmatprep.subr.bf16.mxu0 %v3711_v46  ;;  %v3768_v46 = vld [vmem:[%s5240_s8 + $0x544] ss:$28 sps:$4 sm:$0xff]  }
 0x1a6   :  { %2791 = vmatpush1.bf16.msra.mxu0 %v3709_v48  ;;  %v3766_v48 = vld [vmem:[%s5240_s8 + $0x540] ss:$28 sps:$4 sm:$0xff]  }
 0x1a7   :  { %2792 = vmatprep.subr.bf16.mxu0 %v3717_v50  ;;  %v3774_v50 = vld [vmem:[%s5240_s8 + $0x57c] ss:$28 sps:$4 sm:$0xff]  }
 0x1aa   :  { %2793 = vmatpush1.bf16.msra.mxu0 %v3715_v52  ;;  %v3772_v52 = vld [vmem:[%s5240_s8 + $0x578] ss:$28 sps:$4 sm:$0xff]  }
 0x1ab   :  { %2803 = vmatprep.subr.bf16.mxu0 %v3723_v54  ;;  %v3780_v54 = vld [vmem:[%s5240_s8 + $0x5b4] ss:$28 sps:$4 sm:$0xff]  }
 0x273   :  { %v3372_v29 = vpop.f32.mrb[4].mxu1 }
 0x274   :  { %v3373_v31 = vpop.f32.mrb[5].mxu1 }
 0x275   :  { %v3374_v32 = vadd.f32 %v3373_v31, %v3372_v29  ;;  %v3375_v33 = vpop.f32.mrb[6].mxu1  ;;  %v3658_v29 = vld [vmem:[%s5240_s8 + $0x150] ss:$28 sps:$4 sm:$0xff]   ;;  %v3664_v31 = vld [vmem:[%s5240_s8 + $0x188] ss:$28 sps:$4 sm:$0xff]  }
 0x276   :  { %v3376_v34 = vpop.f32.mrb[7].mxu1  ;;  %v3670_v33 = vld [vmem:[%s5240_s8 + $0x1c0] ss:$28 sps:$4 sm:$0xff]  }
 0x277   :  { %v4451_v35 = vadd.f32 %v3374_v32, %v3100_v30  ;;  %v3666_v30 = vld [vmem:[%s5240_s8 + $0x18c] ss:$28 sps:$4 sm:$0xff]   ;;  %v3672_v32 = vld [vmem:[%s5240_s8 + $0x1c4] ss:$28 sps:$4 sm:$0xff]   ;;  %v3678_v34 = vld [vmem:[%s5240_s8 + $0x1fc] ss:$28 sps:$4 sm:$0xff]  }
 0x279   :  { %v1001_v36 = vmul.f32 0.5, %v4451_v35  ;;  %2973 = vst.msk [vmem:[%s5243_s11] sm:$0xff] %vm1046_vm2, %v4451_v35 }
 0x27b   :  { %v1002_v37 = vmul.f32 1.442695, %v1001_v36  ;;  %v3684_v36 = vld [vmem:[%s5240_s8 + $0x234] ss:$28 sps:$4 sm:$0xff]  }
 0x27d   :  { %3942 = vpow2.f32 %v1002_v37  ;;  %v3682_v37 = vld [vmem:[%s5240_s8 + $0x230] ss:$28 sps:$4 sm:$0xff]  }
 0x287   :  { %v3943_v40 = vpop.eup %3942 }
 0x288   :  { %1006 = vrot.lane.b32.xlu0 %v3943_v40, %s3997_s5  ;;  %v3696_v40 = vld [vmem:[%s5240_s8 + $0x2a4] ss:$28 sps:$4 sm:$0xff]  }
 0x28c   :  { %2975 = vrot.lane.b32.xlu0 %v4451_v35, %s3997_s5 }
 0x2fa   :  { %v1007_v9 = vpop.permute.xlu0 %1006 }
 0x2fb   :  { %v1009_v11 = vmul.f32 %v1007_v9, %v1004_v6  ;;  %v1031_v6 = vrot.slane %v4683_v55, %v1030_v63 }
 0x2fd   :  { %v1010_v13 = vadd.f32 %v1009_v11, %v4451_v35  ;;  %v3676_v35 = vld [vmem:[%s5240_s8 + $0x1f8] ss:$28 sps:$4 sm:$0xff]  }
 0x2fe   :  { %v2976_v14 = vpop.permute.xlu0 %2975  ;;  %v3726_v11 = vld [vmem:[%s5240_s8 + $0x3bc] ss:$28 sps:$4 sm:$0xff]  }
 0x2ff   :  { %v1011_v15 = vpack.c.bf16 %v1010_v13, %v1010_v13  ;;  %2978 = vst.msk [vmem:[%s5244_s12] sm:$0xff] %vm1046_vm2, %v2976_v14 }
 0x301   :  { %3122 = vmatmul.mubr.msk.bf16.vlgmr.msra.gmra.mrb[8].mxu1 %vm1046_vm2, %v1011_v15 }
 0x302   :  { %1105 = vmatpush1.bf16.msra.mxu1 %v1058_v16  ;;  %1136 = vmatprep.mubr.bf16.mxu1 %v3996_v42  ;;  %v3636_v42 = vld [vmem:[%s5240_s8 + $0x74] ss:$28 sps:$4 sm:$0xff]  }
 0x303   :  { %2598 = vmatprep.subr.bf16.mxu1 %v3624_v17  ;;  %v3724_v17 = vld [vmem:[%s5240_s8 + $0x3b8] ss:$28 sps:$4 sm:$0xff]  }
 0x309   :  { %3124 = vmatmul.mubr.msk.bf16.vlgmr.msra.gmra.mrb[12].mxu1 %vm1046_vm2, %v1011_v15 }
 0x30a   :  { %2599 = vmatpush1.bf16.msra.mxu1 %v3622_v18  ;;  %v3727_v18 = vld [vmem:[%s5240_s8 + $0x3c8] ss:$28 sps:$4 sm:$0xff]  }
 0x30b   :  { %2600 = vmatprep.subr.bf16.mxu1 %v3630_v19 }
 0x30e   :  { %2601 = vmatpush1.bf16.msra.mxu1 %v3628_v20  ;;  %v3732_v20 = vld [vmem:[%s5240_s8 + $0x3f4] ss:$28 sps:$4 sm:$0xff]  }
 0x30f   :  { %2602 = vmatprep.subr.bf16.mxu1 %v3636_v42  ;;  %v3735_v42 = vld [vmem:[%s5240_s8 + $0x404] ss:$28 sps:$4 sm:$0xff]  }
 0x312   :  { %2603 = vmatpush1.bf16.msra.mxu1 %v3634_v21 }
 0x313   :  { %2604 = vmatprep.subr.bf16.mxu1 %v3642_v22 }
 0x316   :  { %2605 = vmatpush1.bf16.msra.mxu1 %v3640_v23  ;;  %v3730_v23 = vld [vmem:[%s5240_s8 + $0x3f0] ss:$28 sps:$4 sm:$0xff]  }
 0x317   :  { %2606 = vmatprep.subr.bf16.mxu1 %v3648_v24  ;;  %v3733_v24 = vld [vmem:[%s5240_s8 + $0x400] ss:$28 sps:$4 sm:$0xff]  }
 0x31a   :  { %2607 = vmatpush1.bf16.msra.mxu1 %v3646_v25  ;;  %v3738_v25 = vld [vmem:[%s5240_s8 + $0x42c] ss:$28 sps:$4 sm:$0xff]  }
 0x31b   :  { %2608 = vmatprep.subr.bf16.mxu1 %v3654_v26  ;;  %v3741_v26 = vld [vmem:[%s5240_s8 + $0x43c] ss:$28 sps:$4 sm:$0xff]  }
 0x31e   :  { %2609 = vmatpush1.bf16.msra.mxu1 %v3652_v27  ;;  %v3736_v27 = vld [vmem:[%s5240_s8 + $0x428] ss:$28 sps:$4 sm:$0xff]  }
 0x31f   :  { %2610 = vmatprep.subr.bf16.mxu1 %v3660_v28  ;;  %v3739_v28 = vld [vmem:[%s5240_s8 + $0x438] ss:$28 sps:$4 sm:$0xff]  }
 0x322   :  { %2611 = vmatpush1.bf16.msra.mxu1 %v3658_v29  ;;  %v3744_v29 = vld [vmem:[%s5240_s8 + $0x464] ss:$28 sps:$4 sm:$0xff]  }
 0x323   :  { %2612 = vmatprep.subr.bf16.mxu1 %v3666_v30  ;;  %v3747_v30 = vld [vmem:[%s5240_s8 + $0x474] ss:$28 sps:$4 sm:$0xff]  }
 0x326   :  { %2613 = vmatpush1.bf16.msra.mxu1 %v3664_v31  ;;  %v3742_v31 = vld [vmem:[%s5240_s8 + $0x460] ss:$28 sps:$4 sm:$0xff]  }
 0x327   :  { %2614 = vmatprep.subr.bf16.mxu1 %v3672_v32  ;;  %v3745_v32 = vld [vmem:[%s5240_s8 + $0x470] ss:$28 sps:$4 sm:$0xff]  }
 0x32a   :  { %2615 = vmatpush1.bf16.msra.mxu1 %v3670_v33  ;;  %v3750_v33 = vld [vmem:[%s5240_s8 + $0x49c] ss:$28 sps:$4 sm:$0xff]  }
 0x32b   :  { %2616 = vmatprep.subr.bf16.mxu1 %v3678_v34  ;;  %v3753_v34 = vld [vmem:[%s5240_s8 + $0x4ac] ss:$28 sps:$4 sm:$0xff]  }
 0x32e   :  { %2617 = vmatpush1.bf16.msra.mxu1 %v3676_v35  ;;  %v3748_v35 = vld [vmem:[%s5240_s8 + $0x498] ss:$28 sps:$4 sm:$0xff]  }
 0x32f   :  { %2618 = vmatprep.subr.bf16.mxu1 %v3684_v36  ;;  %v3751_v36 = vld [vmem:[%s5240_s8 + $0x4a8] ss:$28 sps:$4 sm:$0xff]  }
 0x332   :  { %2619 = vmatpush1.bf16.msra.mxu1 %v3682_v37  ;;  %v3756_v37 = vld [vmem:[%s5240_s8 + $0x4d4] ss:$28 sps:$4 sm:$0xff]  }
 0x333   :  { %2620 = vmatprep.subr.bf16.mxu1 %v3690_v38  ;;  %v3759_v38 = vld [vmem:[%s5240_s8 + $0x4e4] ss:$28 sps:$4 sm:$0xff]  }
 0x336   :  { %2621 = vmatpush1.bf16.msra.mxu1 %v3688_v39  ;;  %v3754_v39 = vld [vmem:[%s5240_s8 + $0x4d0] ss:$28 sps:$4 sm:$0xff]  }
 0x337   :  { %2622 = vmatprep.subr.bf16.mxu1 %v3696_v40  ;;  %v3757_v40 = vld [vmem:[%s5240_s8 + $0x4e0] ss:$28 sps:$4 sm:$0xff]  }
 0x33a   :  { %2623 = vmatpush1.bf16.msra.mxu1 %v3694_v41  ;;  %v3762_v41 = vld [vmem:[%s5240_s8 + $0x50c] ss:$28 sps:$4 sm:$0xff]  }
 0x33b   :  { %2624 = vmatprep.subr.bf16.mxu1 %v3702_v43  ;;  %v3765_v43 = vld [vmem:[%s5240_s8 + $0x51c] ss:$28 sps:$4 sm:$0xff]  }
 0x33e   :  { %2625 = vmatpush1.bf16.msra.mxu1 %v3700_v44  ;;  %v3760_v44 = vld [vmem:[%s5240_s8 + $0x508] ss:$28 sps:$4 sm:$0xff]  }
 0x33f   :  { %2626 = vmatprep.subr.bf16.mxu1 %v3708_v45  ;;  %v3763_v45 = vld [vmem:[%s5240_s8 + $0x518] ss:$28 sps:$4 sm:$0xff]  }
 0x342   :  { %2627 = vmatpush1.bf16.msra.mxu1 %v3706_v47  ;;  %v3771_v47 = vld [vmem:[%s5240_s8 + $0x554] ss:$28 sps:$4 sm:$0xff]  }
 0x343   :  { %2628 = vmatprep.subr.bf16.mxu1 %v3714_v49  ;;  %v3769_v49 = vld [vmem:[%s5240_s8 + $0x550] ss:$28 sps:$4 sm:$0xff]  }
 0x346   :  { %2629 = vmatpush1.bf16.msra.mxu1 %v3712_v51  ;;  %v3777_v51 = vld [vmem:[%s5240_s8 + $0x58c] ss:$28 sps:$4 sm:$0xff]  }
 0x347   :  { %2639 = vmatprep.subr.bf16.mxu1 %v3720_v53  ;;  %v3775_v53 = vld [vmem:[%s5240_s8 + $0x588] ss:$28 sps:$4 sm:$0xff]  }
 0x3d4   :  { %v1097_v58 = vpop.f32.mrb[8].mxu1 }
 0x3d5   :  { %v1098_v59 = vadd.f32 %v1097_v58, %v1019_v56  ;;  %v1099_v60 = vpop.f32.mrb[9].mxu1  ;;  %v3783_v56 = vld [vmem:[%s5240_s8 + $0x5c4] ss:$28 sps:$4 sm:$0xff]  }
 0x3d6   :  { %v1100_v61 = vadd.f32 %v1099_v60, %v1023_v57  ;;  %v1101_v62 = vpop.f32.mrb[10].mxu1  ;;  %v3778_v57 = vld [vmem:[%s5240_s8 + $0x5b0] ss:$28 sps:$4 sm:$0xff]   ;;  %v3781_v58 = vld [vmem:[%s5240_s8 + $0x5c0] ss:$28 sps:$4 sm:$0xff]  }
 0x3d7   :  { %v1145_v0 = vmax.f32 %v1098_v59, 0.0  ;;  %v1102_v1 = vpop.f32.mrb[11].mxu1  ;;  %v3786_v59 = vld [vmem:[%s5240_s8 + $0x5ec] ss:$28 sps:$4 sm:$0xff]   ;;  %v3789_v60 = vld [vmem:[%s5240_s8 + $0x5fc] ss:$28 sps:$4 sm:$0xff]  }
 0x3d8   :  { %v1146_v2 = vmax.f32 %v1100_v61, 0.0  ;;  %v3784_v61 = vld [vmem:[%s5240_s8 + $0x5e8] ss:$28 sps:$4 sm:$0xff]   ;;  %v3787_v62 = vld [vmem:[%s5240_s8 + $0x5f8] ss:$28 sps:$4 sm:$0xff]  }
 0x3d9   :  { %v4701_v9 = vpack.c.bf16 %v1145_v0, %v1145_v0  ;;  %v3792_v0 = vld [vmem:[%s5240_s8 + $0x624] ss:$28 sps:$4 sm:$0xff]   ;;  %v3795_v1 = vld [vmem:[%s5240_s8 + $0x634] ss:$28 sps:$4 sm:$0xff]  }
 0x3da   :  { %v4690_v3 = vpack.c.bf16 %v1146_v2, %v1146_v2  ;;  %v3790_v2 = vld [vmem:[%s5240_s8 + $0x620] ss:$28 sps:$4 sm:$0xff]  }
 0x3dc   :  { %v4709_v13 = vpop.f32.mrb[12].mxu1  ;;  %2630 = vmatprep.mubr.bf16.mxu1 %v4690_v3  ;;  %2794 = vmatprep.mubr.bf16.mxu0 %v4690_v3 }
 0x3dd   :  { %v1140_v14 = vpop.f32.mrb[13].mxu1  ;;  %2631 = vmatmul.mubr.bf16.vlgmr.msra.gmra.mrb[16].mxu1 %v4701_v9  ;;  %2795 = vmatmul.mubr.bf16.vlgmr.msra.gmra.mrb[4].mxu0 %v4701_v9 }
 0x3de   :  { %v1141_v15 = vadd.f32 %v1140_v14, %v1031_v6  ;;  %2640 = vmatpush1.bf16.msra.mxu1 %v3718_v4  ;;  %2804 = vmatpush1.bf16.msra.mxu0 %v3721_v5  ;;  %v1142_v16 = vpop.f32.mrb[14].mxu1  ;;  %v3793_v4 = vld [vmem:[%s5240_s8 + $0x630] ss:$28 sps:$4 sm:$0xff]   ;;  %v1026_v5 = vsub.s32 2, %v4429_v7  ;;  %v3798_v6 = vld [vmem:[%s5240_s8 + $0x65c] ss:$28 sps:$4 sm:$0xff]  }
 0x3df   :  { %v1143_v19 = vpop.f32.mrb[15].mxu1  ;;  %2641 = vmatprep.subr.bf16.mxu1 %v3726_v11  ;;  %2805 = vmatprep.subr.bf16.mxu0 %v3729_v12  ;;  %v3801_v11 = vld [vmem:[%s5240_s8 + $0x66c] ss:$28 sps:$4 sm:$0xff]   ;;  %v3796_v12 = vld [vmem:[%s5240_s8 + $0x658] ss:$28 sps:$4 sm:$0xff]  }
 0x3e0   :  { %v1148_v21 = vmax.f32 %v1141_v15, 0.0  ;;  %v3799_v14 = vld [vmem:[%s5240_s8 + $0x668] ss:$28 sps:$4 sm:$0xff]   ;;  %v1027_v15 = vrot.slane %v4683_v55, %v1026_v5  ;;  %v3804_v16 = vld [vmem:[%s5240_s8 + $0x694] ss:$28 sps:$4 sm:$0xff]  }
 0x3e1   :  { %v3805_v55 = vld [vmem:[%s5240_s8 + $0x6a0] ss:$28 sps:$4 sm:$0xff]  }
 0x3e2   :  { %v4727_v22 = vpack.c.bf16 %v1148_v21, %v1148_v21  ;;  %2642 = vmatpush1.bf16.msra.mxu1 %v3724_v17  ;;  %2806 = vmatpush1.bf16.msra.mxu0 %v3727_v18  ;;  %v3807_v17 = vld [vmem:[%s5240_s8 + $0x6a4] ss:$28 sps:$4 sm:$0xff]   ;;  %v3802_v18 = vld [vmem:[%s5240_s8 + $0x690] ss:$28 sps:$4 sm:$0xff]   ;;  %v1139_v19 = vadd.f32 %v4709_v13, %v1027_v15  ;;  %v3811_v13 = vld [vmem:[%s5240_s8 + $0x6d8] ss:$28 sps:$4 sm:$0xff]  }
 0x3e3   :  { %2643 = vmatprep.subr.bf16.mxu1 %v3732_v20  ;;  %2807 = vmatprep.subr.bf16.mxu0 %v3735_v42  ;;  %v3810_v20 = vld [vmem:[%s5240_s8 + $0x6cc] ss:$28 sps:$4 sm:$0xff]   ;;  %v3813_v42 = vld [vmem:[%s5240_s8 + $0x6dc] ss:$28 sps:$4 sm:$0xff]  }
 0x3e4   :  { %2671 = vmatprep.mubr.bf16.mxu1 %v4727_v22  ;;  %2835 = vmatprep.mubr.bf16.mxu0 %v4727_v22  ;;  %v3808_v21 = vld [vmem:[%s5240_s8 + $0x6c8] ss:$28 sps:$4 sm:$0xff]   ;;  %v3874_v15 = vld [vmem:[%s5240_s8 + $0x31c] ss:$28 sps:$4 sm:$0xff]  }
 0x3e6   :  { %2644 = vmatpush1.bf16.msra.mxu1 %v3730_v23  ;;  %2808 = vmatpush1.bf16.msra.mxu0 %v3733_v24  ;;  %v1147_v23 = vmax.f32 %v1139_v19, 0.0  ;;  %v3816_v24 = vld [vmem:[%s5240_s8 + $0xc] ss:$28 sps:$4 sm:$0xff]  }
 0x3e7   :  { %2645 = vmatprep.subr.bf16.mxu1 %v3738_v25  ;;  %2809 = vmatprep.subr.bf16.mxu0 %v3741_v26  ;;  %v3817_v25 = vld [vmem:[%s5240_s8 + $0x558] ss:$28 sps:$4 sm:$0xff]   ;;  %v3814_v26 = vld [vmem:[%s5240_s8 + $0x8] ss:$28 sps:$4 sm:$0xff]  }
 0x3e8   :  { %v3878_v19 = vld [vmem:[%s5240_s8 + $0x388] ss:$28 sps:$4 sm:$0xff]  }
 0x3ea   :  { %2646 = vmatpush1.bf16.msra.mxu1 %v3736_v27  ;;  %2810 = vmatpush1.bf16.msra.mxu0 %v3739_v28  ;;  %v4907_v27 = vpack.c.bf16 %v1147_v23, %v1147_v23  ;;  %v3818_v28 = vld [vmem:[%s5240_s8 + $0x398] ss:$28 sps:$4 sm:$0xff]  }
 0x3eb   :  { %2647 = vmatprep.subr.bf16.mxu1 %v3744_v29  ;;  %2811 = vmatprep.subr.bf16.mxu0 %v3747_v30  ;;  %v3821_v29 = vld [vmem:[%s5240_s8 + $0x44] ss:$28 sps:$4 sm:$0xff]   ;;  %v3822_v30 = vld [vmem:[%s5240_s8 + $0x590] ss:$28 sps:$4 sm:$0xff]  }
 0x3ec   :  { %v3889_v23 = vld [vmem:[%s5240_s8 + $0x434] ss:$28 sps:$4 sm:$0xff]  }
 0x3ee   :  { %2648 = vmatpush1.bf16.msra.mxu1 %v3742_v31  ;;  %2812 = vmatpush1.bf16.msra.mxu0 %v3745_v32  ;;  %v3819_v31 = vld [vmem:[%s5240_s8 + $0x40] ss:$28 sps:$4 sm:$0xff]   ;;  %v3823_v32 = vld [vmem:[%s5240_s8 + $0x3d0] ss:$28 sps:$4 sm:$0xff]  }
 0x3ef   :  { %2649 = vmatprep.subr.bf16.mxu1 %v3750_v33  ;;  %2813 = vmatprep.subr.bf16.mxu0 %v3753_v34  ;;  %v3826_v33 = vld [vmem:[%s5240_s8 + $0x7c] ss:$28 sps:$4 sm:$0xff]   ;;  %v3827_v34 = vld [vmem:[%s5240_s8 + $0x5c8] ss:$28 sps:$4 sm:$0xff]  }
 0x3f2   :  { %2650 = vmatpush1.bf16.msra.mxu1 %v3748_v35  ;;  %2814 = vmatpush1.bf16.msra.mxu0 %v3751_v36  ;;  %v3824_v35 = vld [vmem:[%s5240_s8 + $0x78] ss:$28 sps:$4 sm:$0xff]   ;;  %v3828_v36 = vld [vmem:[%s5240_s8 + $0x408] ss:$28 sps:$4 sm:$0xff]  }
 0x3f3   :  { %2651 = vmatprep.subr.bf16.mxu1 %v3756_v37  ;;  %2815 = vmatprep.subr.bf16.mxu0 %v3759_v38  ;;  %v3831_v37 = vld [vmem:[%s5240_s8 + $0xb4] ss:$28 sps:$4 sm:$0xff]   ;;  %v3832_v38 = vld [vmem:[%s5240_s8 + $0x600] ss:$28 sps:$4 sm:$0xff]  }
 0x3f6   :  { %2652 = vmatpush1.bf16.msra.mxu1 %v3754_v39  ;;  %2816 = vmatpush1.bf16.msra.mxu0 %v3757_v40  ;;  %v3829_v39 = vld [vmem:[%s5240_s8 + $0xb0] ss:$28 sps:$4 sm:$0xff]   ;;  %v3833_v40 = vld [vmem:[%s5240_s8 + $0x440] ss:$28 sps:$4 sm:$0xff]  }
 0x3f7   :  { %2653 = vmatprep.subr.bf16.mxu1 %v3762_v41  ;;  %2817 = vmatprep.subr.bf16.mxu0 %v3765_v43  ;;  %v3836_v41 = vld [vmem:[%s5240_s8 + $0xec] ss:$28 sps:$4 sm:$0xff]   ;;  %v3837_v43 = vld [vmem:[%s5240_s8 + $0x638] ss:$28 sps:$4 sm:$0xff]  }
 0x3fa   :  { %2654 = vmatpush1.bf16.msra.mxu1 %v3760_v44  ;;  %2818 = vmatpush1.bf16.msra.mxu0 %v3763_v45  ;;  %v3834_v44 = vld [vmem:[%s5240_s8 + $0xe8] ss:$28 sps:$4 sm:$0xff]   ;;  %v3838_v45 = vld [vmem:[%s5240_s8 + $0x478] ss:$28 sps:$4 sm:$0xff]  }
 0x3fb   :  { %2655 = vmatprep.subr.bf16.mxu1 %v3768_v46  ;;  %2819 = vmatprep.subr.bf16.mxu0 %v3771_v47  ;;  %v3841_v46 = vld [vmem:[%s5240_s8 + $0x124] ss:$28 sps:$4 sm:$0xff]   ;;  %v3842_v47 = vld [vmem:[%s5240_s8 + $0x670] ss:$28 sps:$4 sm:$0xff]  }
 0x3fe   :  { %2656 = vmatpush1.bf16.msra.mxu1 %v3766_v48  ;;  %2820 = vmatpush1.bf16.msra.mxu0 %v3769_v49  ;;  %v3839_v48 = vld [vmem:[%s5240_s8 + $0x120] ss:$28 sps:$4 sm:$0xff]   ;;  %v3843_v49 = vld [vmem:[%s5240_s8 + $0x4b0] ss:$28 sps:$4 sm:$0xff]  }
 0x3ff   :  { %2657 = vmatprep.subr.bf16.mxu1 %v3774_v50  ;;  %2821 = vmatprep.subr.bf16.mxu0 %v3777_v51  ;;  %v3846_v50 = vld [vmem:[%s5240_s8 + $0x15c] ss:$28 sps:$4 sm:$0xff]   ;;  %v3847_v51 = vld [vmem:[%s5240_s8 + $0x6a8] ss:$28 sps:$4 sm:$0xff]  }
 0x402   :  { %2658 = vmatpush1.bf16.msra.mxu1 %v3772_v52  ;;  %2822 = vmatpush1.bf16.msra.mxu0 %v3775_v53  ;;  %v3844_v52 = vld [vmem:[%s5240_s8 + $0x158] ss:$28 sps:$4 sm:$0xff]   ;;  %v3848_v53 = vld [vmem:[%s5240_s8 + $0x4e8] ss:$28 sps:$4 sm:$0xff]  }
 0x403   :  { %2659 = vmatprep.subr.bf16.mxu1 %v3780_v54  ;;  %2823 = vmatprep.subr.bf16.mxu0 %v3783_v56  ;;  %v3851_v54 = vld [vmem:[%s5240_s8 + $0x194] ss:$28 sps:$4 sm:$0xff]   ;;  %v3852_v56 = vld [vmem:[%s5240_s8 + $0x6e0] ss:$28 sps:$4 sm:$0xff]  }
 0x406   :  { %2660 = vmatpush1.bf16.msra.mxu1 %v3778_v57  ;;  %2824 = vmatpush1.bf16.msra.mxu0 %v3781_v58  ;;  %v3849_v57 = vld [vmem:[%s5240_s8 + $0x190] ss:$28 sps:$4 sm:$0xff]   ;;  %v3853_v58 = vld [vmem:[%s5240_s8 + $0x520] ss:$28 sps:$4 sm:$0xff]  }
 0x407   :  { %2661 = vmatprep.subr.bf16.mxu1 %v3786_v59  ;;  %2825 = vmatprep.subr.bf16.mxu0 %v3789_v60  ;;  %v3856_v59 = vld [vmem:[%s5240_s8 + $0x1cc] ss:$28 sps:$4 sm:$0xff]  }
 0x408   :  { %v3854_v60 = vld [vmem:[%s5240_s8 + $0x1c8] ss:$28 sps:$4 sm:$0xff]  }
 0x40a   :  { %2662 = vmatpush1.bf16.msra.mxu1 %v3784_v61  ;;  %2826 = vmatpush1.bf16.msra.mxu0 %v3787_v62  ;;  %v3859_v61 = vld [vmem:[%s5240_s8 + $0x204] ss:$28 sps:$4 sm:$0xff]  }
 0x40b   :  { %2663 = vmatprep.subr.bf16.mxu1 %v3792_v0  ;;  %2827 = vmatprep.subr.bf16.mxu0 %v3795_v1  ;;  %v3857_v62 = vld [vmem:[%s5240_s8 + $0x200] ss:$28 sps:$4 sm:$0xff]   ;;  %v3860_v1 = vld [vmem:[%s5240_s8 + $0x238] ss:$28 sps:$4 sm:$0xff]  }
 0x40c   :  { %v3862_v0 = vld [vmem:[%s5240_s8 + $0x23c] ss:$28 sps:$4 sm:$0xff]  }
 0x40e   :  { %2664 = vmatpush1.bf16.msra.mxu1 %v3790_v2  ;;  %2828 = vmatpush1.bf16.msra.mxu0 %v3793_v4  ;;  %v3865_v2 = vld [vmem:[%s5240_s8 + $0x274] ss:$28 sps:$4 sm:$0xff]  }
 0x40f   :  { %2665 = vmatprep.subr.bf16.mxu1 %v3798_v6  ;;  %2829 = vmatprep.subr.bf16.mxu0 %v3801_v11  ;;  %v3863_v4 = vld [vmem:[%s5240_s8 + $0x270] ss:$28 sps:$4 sm:$0xff]   ;;  %v3866_v11 = vld [vmem:[%s5240_s8 + $0x2a8] ss:$28 sps:$4 sm:$0xff]  }
 0x410   :  { %v3868_v6 = vld [vmem:[%s5240_s8 + $0x2ac] ss:$28 sps:$4 sm:$0xff]  }
 0x412   :  { %2666 = vmatpush1.bf16.msra.mxu1 %v3796_v12  ;;  %2830 = vmatpush1.bf16.msra.mxu0 %v3799_v14  ;;  %v3871_v12 = vld [vmem:[%s5240_s8 + $0x2e4] ss:$28 sps:$4 sm:$0xff]  }
 0x413   :  { %2667 = vmatprep.subr.bf16.mxu1 %v3804_v16  ;;  %2831 = vmatprep.subr.bf16.mxu0 %v3807_v17  ;;  %v3869_v14 = vld [vmem:[%s5240_s8 + $0x2e0] ss:$28 sps:$4 sm:$0xff]   ;;  %v3872_v16 = vld [vmem:[%s5240_s8 + $0x318] ss:$28 sps:$4 sm:$0xff]  }
 0x414   :  { %v3877_v17 = vld [vmem:[%s5240_s8 + $0x354] ss:$28 sps:$4 sm:$0xff]  }
 0x416   :  { %2668 = vmatpush1.bf16.msra.mxu1 %v3802_v18  ;;  %2832 = vmatpush1.bf16.msra.mxu0 %v3805_v55  ;;  %v3875_v18 = vld [vmem:[%s5240_s8 + $0x350] ss:$28 sps:$4 sm:$0xff]  }
 0x417   :  { %2669 = vmatprep.subr.bf16.mxu1 %v3810_v20  ;;  %2833 = vmatprep.subr.bf16.mxu0 %v3813_v42  ;;  %v3880_v55 = vld [vmem:[%s5240_s8 + $0x38c] ss:$28 sps:$4 sm:$0xff]   ;;  %v3883_v20 = vld [vmem:[%s5240_s8 + $0x3c4] ss:$28 sps:$4 sm:$0xff]  }
 0x418   :  { %v3881_v42 = vld [vmem:[%s5240_s8 + $0x3c0] ss:$28 sps:$4 sm:$0xff]  }
 0x41a   :  { %2670 = vmatpush1.bf16.msra.mxu1 %v3808_v21  ;;  %2834 = vmatpush1.bf16.msra.mxu0 %v3811_v13  ;;  %v3886_v21 = vld [vmem:[%s5240_s8 + $0x3fc] ss:$28 sps:$4 sm:$0xff]  }
 0x41b   :  { %2680 = vmatprep.subr.bf16.mxu1 %v3816_v24  ;;  %3400 = vmatprep.subr.bf16.mxu0 %v3817_v25  ;;  %v3884_v13 = vld [vmem:[%s5240_s8 + $0x3f8] ss:$28 sps:$4 sm:$0xff]   ;;  %v3892_v24 = vld [vmem:[%s5240_s8 + $0x46c] ss:$28 sps:$4 sm:$0xff]  }
 0x41c   :  { %v3890_v25 = vld [vmem:[%s5240_s8 + $0x468] ss:$28 sps:$4 sm:$0xff]  }
 0x41d   :  { %2672 = vmatmul.mubr.bf16.vlgmr.msra.gmra.mrb[16].mxu1 %v4907_v27  ;;  %2836 = vmatmul.mubr.bf16.vlgmr.msra.gmra.mrb[4].mxu0 %v4907_v27 }
 0x41e   :  { %2681 = vmatpush1.bf16.msra.mxu1 %v3814_v26  ;;  %2712 = vmatprep.mubr.bf16.mxu1 %v4690_v3  ;;  %v3895_v26 = vld [vmem:[%s5240_s8 + $0x4a4] ss:$28 sps:$4 sm:$0xff]  }
 0x41f   :  { %3401 = vmatpush3.bf16.msra.mxu0 %v3818_v28  ;;  %2916 = vmatprep.mubr.bf16.mxu0 %v4727_v22  ;;  %v3893_v28 = vld [vmem:[%s5240_s8 + $0x4a0] ss:$28 sps:$4 sm:$0xff]  }
 0x420   :  { %2682 = vmatprep.subr.bf16.mxu1 %v3821_v29  ;;  %3402 = vmatprep.subr.bf16.mxu0 %v3822_v30  ;;  %v3898_v29 = vld [vmem:[%s5240_s8 + $0x4dc] ss:$28 sps:$4 sm:$0xff]  }
 0x421   :  { %v3896_v30 = vld [vmem:[%s5240_s8 + $0x4d8] ss:$28 sps:$4 sm:$0xff]  }
 0x422   :  { %2683 = vmatpush1.bf16.msra.mxu1 %v3819_v31  ;;  %v3901_v31 = vld [vmem:[%s5240_s8 + $0x514] ss:$28 sps:$4 sm:$0xff]  }
 0x423   :  { %3403 = vmatpush3.bf16.msra.mxu0 %v3823_v32  ;;  %2684 = vmatprep.subr.bf16.mxu1 %v3826_v33  ;;  %v3899_v32 = vld [vmem:[%s5240_s8 + $0x510] ss:$28 sps:$4 sm:$0xff]  }
 0x424   :  { %3404 = vmatprep.subr.bf16.mxu0 %v3827_v34  ;;  %v3904_v33 = vld [vmem:[%s5240_s8 + $0x54c] ss:$28 sps:$4 sm:$0xff]  }
 0x425   :  { %v3902_v34 = vld [vmem:[%s5240_s8 + $0x548] ss:$28 sps:$4 sm:$0xff]  }
 0x426   :  { %2685 = vmatpush1.bf16.msra.mxu1 %v3824_v35  ;;  %v3907_v35 = vld [vmem:[%s5240_s8 + $0x584] ss:$28 sps:$4 sm:$0xff]  }
 0x427   :  { %3405 = vmatpush3.bf16.msra.mxu0 %v3828_v36  ;;  %2686 = vmatprep.subr.bf16.mxu1 %v3831_v37  ;;  %v3905_v36 = vld [vmem:[%s5240_s8 + $0x580] ss:$28 sps:$4 sm:$0xff]  }
 0x428   :  { %3406 = vmatprep.subr.bf16.mxu0 %v3832_v38  ;;  %v3910_v37 = vld [vmem:[%s5240_s8 + $0x5bc] ss:$28 sps:$4 sm:$0xff]  }
 0x429   :  { %v3908_v38 = vld [vmem:[%s5240_s8 + $0x5b8] ss:$28 sps:$4 sm:$0xff]  }
 0x42a   :  { %2687 = vmatpush1.bf16.msra.mxu1 %v3829_v39  ;;  %v3913_v39 = vld [vmem:[%s5240_s8 + $0x5f4] ss:$28 sps:$4 sm:$0xff]  }
 0x42b   :  { %3407 = vmatpush3.bf16.msra.mxu0 %v3833_v40  ;;  %2688 = vmatprep.subr.bf16.mxu1 %v3836_v41  ;;  %v3911_v40 = vld [vmem:[%s5240_s8 + $0x5f0] ss:$28 sps:$4 sm:$0xff]  }
 0x42c   :  { %3408 = vmatprep.subr.bf16.mxu0 %v3837_v43  ;;  %v3916_v41 = vld [vmem:[%s5240_s8 + $0x62c] ss:$28 sps:$4 sm:$0xff]  }
 0x42d   :  { %v3914_v43 = vld [vmem:[%s5240_s8 + $0x628] ss:$28 sps:$4 sm:$0xff]  }
 0x42e   :  { %2689 = vmatpush1.bf16.msra.mxu1 %v3834_v44  ;;  %v3919_v44 = vld [vmem:[%s5240_s8 + $0x664] ss:$28 sps:$4 sm:$0xff]  }
 0x42f   :  { %3409 = vmatpush3.bf16.msra.mxu0 %v3838_v45  ;;  %2690 = vmatprep.subr.bf16.mxu1 %v3841_v46  ;;  %v3917_v45 = vld [vmem:[%s5240_s8 + $0x660] ss:$28 sps:$4 sm:$0xff]  }
 0x430   :  { %3410 = vmatprep.subr.bf16.mxu0 %v3842_v47  ;;  %v3922_v46 = vld [vmem:[%s5240_s8 + $0x69c] ss:$28 sps:$4 sm:$0xff]  }
 0x431   :  { %v3920_v47 = vld [vmem:[%s5240_s8 + $0x698] ss:$28 sps:$4 sm:$0xff]  }
 0x432   :  { %2691 = vmatpush1.bf16.msra.mxu1 %v3839_v48  ;;  %v3925_v48 = vld [vmem:[%s5240_s8 + $0x6d4] ss:$28 sps:$4 sm:$0xff]  }
 0x433   :  { %3411 = vmatpush3.bf16.msra.mxu0 %v3843_v49  ;;  %2692 = vmatprep.subr.bf16.mxu1 %v3846_v50  ;;  %v3923_v49 = vld [vmem:[%s5240_s8 + $0x6d0] ss:$28 sps:$4 sm:$0xff]   ;;  %v3926_v50 = vld [vmem:[%s5240_s8 + $0x1d8] ss:$28 sps:$4 sm:$0xff]  }
 0x434   :  { %3412 = vmatprep.subr.bf16.mxu0 %v3847_v51  ;;  %v3927_v51 = vld [vmem:[%s5240_s8 + $0x18] ss:$28 sps:$4 sm:$0xff]  }
 0x436   :  { %2693 = vmatpush1.bf16.msra.mxu1 %v3844_v52  ;;  %v3928_v52 = vld [vmem:[%s5240_s8 + $0x210] ss:$28 sps:$4 sm:$0xff]  }
 0x437   :  { %3413 = vmatpush3.bf16.msra.mxu0 %v3848_v53  ;;  %2694 = vmatprep.subr.bf16.mxu1 %v3851_v54  ;;  %v3929_v53 = vld [vmem:[%s5240_s8 + $0x50] ss:$28 sps:$4 sm:$0xff]   ;;  %v3930_v54 = vld [vmem:[%s5240_s8 + $0x248] ss:$28 sps:$4 sm:$0xff]  }
 0x438   :  { %3414 = vmatprep.subr.bf16.mxu0 %v3852_v56  ;;  %v3931_v56 = vld [vmem:[%s5240_s8 + $0x88] ss:$28 sps:$4 sm:$0xff]  }
 0x43a   :  { %2695 = vmatpush1.bf16.msra.mxu1 %v3849_v57  ;;  %v3934_v57 = vld [vmem:[%s5240_s8 + $0x2b8] ss:$28 sps:$4 sm:$0xff]  }
 0x43b   :  { %3415 = vmatpush3.bf16.msra.mxu0 %v3853_v58  ;;  %2696 = vmatprep.subr.bf16.mxu1 %v3856_v59  ;;  %v3935_v58 = vld [vmem:[%s5240_s8 + $0xf8] ss:$28 sps:$4 sm:$0xff]   ;;  %v3936_v59 = vld [vmem:[%s5240_s8 + $0x2f0] ss:$28 sps:$4 sm:$0xff]  }
 0x43e   :  { %2917 = vmatmul.mubr.bf16.vlgmr.msra.gmra.mrb[8].mxu0 %v4907_v27  ;;  %2697 = vmatpush1.bf16.msra.mxu1 %v3854_v60  ;;  %v3937_v60 = vld [vmem:[%s5240_s8 + $0x130] ss:$28 sps:$4 sm:$0xff]  }
 0x43f   :  { %2698 = vmatprep.subr.bf16.mxu1 %v3859_v61  ;;  %v3938_v61 = vld [vmem:[%s5240_s8 + $0x328] ss:$28 sps:$4 sm:$0xff]  }
 0x442   :  { %2699 = vmatpush1.bf16.msra.mxu1 %v3857_v62  ;;  %v3939_v62 = vld [vmem:[%s5240_s8 + $0x168] ss:$28 sps:$4 sm:$0xff]  }
 0x443   :  { %2700 = vmatprep.subr.bf16.mxu1 %v3862_v0  ;;  %v3940_v0 = vld [vmem:[%s5240_s8 + $0x360] ss:$28 sps:$4 sm:$0xff]  }
 0x446   :  { %2701 = vmatpush1.bf16.msra.mxu1 %v3860_v1  ;;  %v3941_v1 = vld [vmem:[%s5240_s8 + $0x1a0] ss:$28 sps:$4 sm:$0xff]  }
 0x447   :  { %2702 = vmatprep.subr.bf16.mxu1 %v3865_v2  ;;  %v1429_v2 = vsub.s32 4, %v4429_v7 }
 0x44a   :  { %2703 = vmatpush1.bf16.msra.mxu1 %v3863_v4  ;;  %v5202_v4 = vld [vmem:[%s5241_s9] sm:$0x7f] }
 0x44b   :  { %2704 = vmatprep.subr.bf16.mxu1 %v3868_v6  ;;  %v1433_v6 = vsub.s32 5, %v4429_v7 }
 0x44e   :  { %2705 = vmatpush1.bf16.msra.mxu1 %v3866_v11  ;;  %v1414_v11 = vrot.slane %v5202_v4, %v4432_v8 }
 0x44f   :  { %2706 = vmatprep.subr.bf16.mxu1 %v3871_v12  ;;  %v1430_v12 = vrot.slane %v5202_v4, %v1429_v2 }
 0x452   :  { %2707 = vmatpush1.bf16.msra.mxu1 %v3869_v14  ;;  %v1418_v14 = vrot.slane %v5202_v4, %v4438_v10 }
 0x453   :  { %2708 = vmatprep.subr.bf16.mxu1 %v3874_v15  ;;  %v1434_v15 = vrot.slane %v5202_v4, %v1433_v6 }
 0x456   :  { %2709 = vmatpush1.bf16.msra.mxu1 %v3872_v16 }
 0x457   :  { %2710 = vmatprep.subr.bf16.mxu1 %v3877_v17 }
 0x45a   :  { %2711 = vmatpush1.bf16.msra.mxu1 %v3875_v18 }
 0x45b   :  { %2721 = vmatprep.subr.bf16.mxu1 %v3880_v55 }
 0x45d   :  { %2713 = vmatmul.mubr.bf16.vlgmr.msra.gmra.mrb[20].mxu1 %v4701_v9 }
 0x45e   :  { %2722 = vmatpush1.bf16.msra.mxu1 %v3878_v19  ;;  %2753 = vmatprep.mubr.bf16.mxu1 %v4727_v22  ;;  %v3887_v22 = vld [vmem:[%s5240_s8 + $0x430] ss:$28 sps:$4 sm:$0xff]  }
 0x45f   :  { %2723 = vmatprep.subr.bf16.mxu1 %v3883_v20 }
 0x462   :  { %2724 = vmatpush1.bf16.msra.mxu1 %v3881_v42 }
 0x463   :  { %2725 = vmatprep.subr.bf16.mxu1 %v3886_v21 }
 0x466   :  { %2726 = vmatpush1.bf16.msra.mxu1 %v3884_v13 }
 0x467   :  { %2727 = vmatprep.subr.bf16.mxu1 %v3889_v23 }
 0x46a   :  { %2728 = vmatpush1.bf16.msra.mxu1 %v3887_v22 }
 0x46b   :  { %2729 = vmatprep.subr.bf16.mxu1 %v3892_v24 }
 0x46e   :  { %2730 = vmatpush1.bf16.msra.mxu1 %v3890_v25 }
 0x46f   :  { %2731 = vmatprep.subr.bf16.mxu1 %v3895_v26 }
 0x472   :  { %2732 = vmatpush1.bf16.msra.mxu1 %v3893_v28 }
 0x473   :  { %2733 = vmatprep.subr.bf16.mxu1 %v3898_v29 }
 0x476   :  { %2734 = vmatpush1.bf16.msra.mxu1 %v3896_v30 }
 0x477   :  { %2735 = vmatprep.subr.bf16.mxu1 %v3901_v31 }
 0x47a   :  { %2736 = vmatpush1.bf16.msra.mxu1 %v3899_v32 }
 0x47b   :  { %2737 = vmatprep.subr.bf16.mxu1 %v3904_v33 }
 0x47e   :  { %2738 = vmatpush1.bf16.msra.mxu1 %v3902_v34 }
 0x47f   :  { %2739 = vmatprep.subr.bf16.mxu1 %v3907_v35 }
 0x482   :  { %2740 = vmatpush1.bf16.msra.mxu1 %v3905_v36 }
 0x483   :  { %2741 = vmatprep.subr.bf16.mxu1 %v3910_v37 }
 0x486   :  { %2742 = vmatpush1.bf16.msra.mxu1 %v3908_v38 }
 0x487   :  { %2743 = vmatprep.subr.bf16.mxu1 %v3913_v39 }
 0x48a   :  { %2744 = vmatpush1.bf16.msra.mxu1 %v3911_v40 }
 0x48b   :  { %2745 = vmatprep.subr.bf16.mxu1 %v3916_v41 }
 0x48e   :  { %2746 = vmatpush1.bf16.msra.mxu1 %v3914_v43 }
 0x48f   :  { %2747 = vmatprep.subr.bf16.mxu1 %v3919_v44 }
 0x492   :  { %2748 = vmatpush1.bf16.msra.mxu1 %v3917_v45  ;;  %v1422_v45 = vrot.slane %v5202_v4, %v1026_v5 }
 0x493   :  { %2749 = vmatprep.subr.bf16.mxu1 %v3922_v46  ;;  %v1426_v46 = vrot.slane %v5202_v4, %v1030_v63 }
 0x496   :  { %2750 = vmatpush1.bf16.msra.mxu1 %v3920_v47 }
 0x497   :  { %2751 = vmatprep.subr.bf16.mxu1 %v3925_v48 }
 0x49a   :  { %2752 = vmatpush1.bf16.msra.mxu1 %v3923_v49 }
 0x49b   :  { %3378 = vmatprep.subr.bf16.mxu1 %v3926_v50 }
 0x49d   :  { %2754 = vmatmul.mubr.bf16.vlgmr.msra.gmra.mrb[20].mxu1 %v4907_v27  ;;  %v3932_v27 = vld [vmem:[%s5240_s8 + $0x280] ss:$28 sps:$4 sm:$0xff]  }
 0x49e   :  { %3379 = vmatpush3.bf16.msra.mxu1 %v3927_v51  ;;  %2876 = vmatprep.mubr.bf16.mxu1 %v4690_v3  ;;  %v3933_v3 = vld [vmem:[%s5240_s8 + $0xc0] ss:$28 sps:$4 sm:$0xff]   ;;  %s3998_s8 = smov [#allocation2]  }
 0x49f   :  { %3380 = vmatprep.subr.bf16.mxu1 %v3928_v52  ;;  %s2985_s9 = sshll.u32 %s3998_s8, 4  ;;  %s2986_s9 = int_to_ptr.vmem [resolvable:$true] %s2985_s9 }
 0x4a0   :  { %s3972_s12 = scalar_lea.vmem %s2986_s9, 896  ;;  %p3977_p1 = scmp.lt.s32.totalorder %s2986_s9, %s2986_s9 }
 0x4a1   :  { %p3973_p0 = scmp.ne.s32.totalorder %s2986_s9, %s3972_s12  ;;  %p3978_p2 = scmp.lt.s32.totalorder %s3972_s12, %s3972_s12 }
 0x4a2   :  { %3381 = vmatpush3.bf16.msra.mxu1 %v3929_v53 }
 0x4a3   :  { %3382 = vmatprep.subr.bf16.mxu1 %v3930_v54  ;;  %p3979_p3 = por %p3978_p2, %p3977_p1 }
 0x4a5   :  { %p3980_p4 = pnand %p3979_p3, %p3973_p0 }
 0x4a6   :  { %3383 = vmatpush3.bf16.msra.mxu1 %v3931_v56 }
 0x4a7   :  { %3384 = vmatprep.subr.bf16.mxu1 %v3932_v27 }
 0x4aa   :  { %3385 = vmatpush3.bf16.msra.mxu1 %v3933_v3 }
 0x4ab   :  { %3386 = vmatprep.subr.bf16.mxu1 %v3934_v57 }
 0x4ae   :  { %3387 = vmatpush3.bf16.msra.mxu1 %v3935_v58  ;;  %v1437_v58 = vsub.s32 6, %v4429_v7 }
 0x4af   :  { %3388 = vmatprep.subr.bf16.mxu1 %v3936_v59 }
 0x4b2   :  { %3389 = vmatpush3.bf16.msra.mxu1 %v3937_v60  ;;  %v1438_v60 = vrot.slane %v5202_v4, %v1437_v58 }
 0x4b3   :  { %3390 = vmatprep.subr.bf16.mxu1 %v3938_v61 }
 0x4b6   :  { %3391 = vmatpush3.bf16.msra.mxu1 %v3939_v62 }
 0x4b7   :  { %3392 = vmatprep.subr.bf16.mxu1 %v3940_v0 }
 0x4ba   :  { %3393 = vmatpush3.bf16.msra.mxu1 %v3941_v1 }
 0x4bd   :  { %2877 = vmatmul.mubr.bf16.vlgmr.msra.gmra.mrb[24].mxu1 %v4701_v9 }
 0x4f0   :  { %v2673_v9 = vpop.f32.mrb[16].mxu1  ;;  %v2837_v16 = vpop.f32.mrb[4].mxu0 }
 0x4f1   :  { %v3426_v17 = vadd.f32 %v2673_v9, %v1414_v11  ;;  %v3430_v18 = vadd.f32 %v2837_v16, %v1430_v12  ;;  %v2675_v55 = vpop.f32.mrb[17].mxu1  ;;  %v2839_v19 = vpop.f32.mrb[5].mxu0 }
 0x4f2   :  { %v3427_v20 = vadd.f32 %v2675_v55, %v1418_v14  ;;  %v3431_v42 = vadd.f32 %v2839_v19, %v1434_v15  ;;  %v2677_v21 = vpop.f32.mrb[18].mxu1  ;;  %v2841_v13 = vpop.f32.mrb[6].mxu0 }
 0x4f3   :  { %v3349_v23 = vmul.f32 -1.442695, %v3426_v17  ;;  %v3353_v22 = vmul.f32 -1.442695, %v3430_v18  ;;  %v2678_v8 = vpop.f32.mrb[19].mxu1  ;;  %v2842_v24 = vpop.f32.mrb[7].mxu0 }
 0x4f4   :  { %v3350_v25 = vmul.f32 -1.442695, %v3427_v20  ;;  %v3354_v26 = vmul.f32 -1.442695, %v3431_v42 }
 0x4f5   :  { %3944 = vpow2.f32 %v3349_v23 }
 0x4f6   :  { %3946 = vpow2.f32 %v3353_v22 }
 0x4f7   :  { %3948 = vpow2.f32 %v3350_v25 }
 0x4f8   :  { %3950 = vpow2.f32 %v3354_v26 }
 0x4ff   :  { %v3945_v10 = vpop.eup %3944 }
 0x500   :  { %v3947_v28 = vpop.eup %3946  ;;  %v2945_v29 = vadd.f32 1.0, %v3945_v10 }
 0x501   :  { %v3949_v30 = vpop.eup %3948  ;;  %v2949_v31 = vadd.f32 1.0, %v3947_v28 }
 0x502   :  { %v3951_v32 = vpop.eup %3950  ;;  %3952 = vrcp.f32 %v2945_v29  ;;  %v2946_v33 = vadd.f32 1.0, %v3949_v30 }
 0x503   :  { %3954 = vrcp.f32 %v2949_v31  ;;  %v2950_v34 = vadd.f32 1.0, %v3951_v32 }
 0x504   :  { %3956 = vrcp.f32 %v2946_v33 }
 0x505   :  { %3958 = vrcp.f32 %v2950_v34 }
 0x50c   :  { %v3953_v35 = vpop.eup %3952 }
 0x50d   :  { %v3955_v36 = vpop.eup %3954  ;;  %2966 = vst [vmem:[#allocation2] sm:$0xff] %v3953_v35 }
 0x50e   :  { %v3957_v37 = vpop.eup %3956  ;;  %2970 = vst [vmem:[#allocation2 + $0x20] sm:$0xff] %v3955_v36 }
 0x50f   :  { %v3959_v38 = vpop.eup %3958  ;;  %2967 = vst [vmem:[#allocation2 + $0x8] sm:$0xff] %v3957_v37 }
 0x510   :  { %2971 = vst [vmem:[#allocation2 + $0x28] sm:$0xff] %v3959_v38 }
 0x511   :  { %v3416_v39 = vpop.f32.mrb[8].mxu0 }
 0x512   :  { %v3417_v40 = vpop.f32.mrb[9].mxu0 }
 0x513   :  { %v3418_v41 = vadd.f32 %v3417_v40, %v3416_v39  ;;  %v3419_v43 = vpop.f32.mrb[10].mxu0 }
 0x514   :  { %v3420_v44 = vpop.f32.mrb[11].mxu0 }
 0x570   :  { %v2755_v47 = vpop.f32.mrb[20].mxu1 }
 0x571   :  { %v3428_v48 = vadd.f32 %v2755_v47, %v1422_v45  ;;  %v2757_v49 = vpop.f32.mrb[21].mxu1 }
 0x572   :  { %v3429_v50 = vadd.f32 %v2757_v49, %v1426_v46  ;;  %v2759_v51 = vpop.f32.mrb[22].mxu1 }
 0x573   :  { %v3351_v52 = vmul.f32 -1.442695, %v3428_v48  ;;  %v2760_v53 = vpop.f32.mrb[23].mxu1 }
 0x574   :  { %v3352_v54 = vmul.f32 -1.442695, %v3429_v50 }
 0x575   :  { %3960 = vpow2.f32 %v3351_v52 }
 0x576   :  { %3962 = vpow2.f32 %v3352_v54 }
 0x57f   :  { %v3961_v56 = vpop.eup %3960 }
 0x580   :  { %v3963_v27 = vpop.eup %3962  ;;  %v2947_v3 = vadd.f32 1.0, %v3961_v56 }
 0x581   :  { %v2948_v57 = vadd.f32 1.0, %v3963_v27 }
 0x582   :  { %3964 = vrcp.f32 %v2947_v3 }
 0x583   :  { %3966 = vrcp.f32 %v2948_v57 }
 0x58c   :  { %v3965_v5 = vpop.eup %3964 }
 0x58d   :  { %v3967_v63 = vpop.eup %3966  ;;  %2968 = vst [vmem:[#allocation2 + $0x10] sm:$0xff] %v3965_v5 }
 0x58e   :  { %2969 = vst [vmem:[#allocation2 + $0x18] sm:$0xff] %v3967_v63 }
 0x590   :  { %v3394_v59 = vpop.f32.mrb[24].mxu1 }
 0x591   :  { %v3395_v61 = vpop.f32.mrb[25].mxu1 }
 0x592   :  { %v3396_v62 = vadd.f32 %v3395_v61, %v3394_v59  ;;  %v3397_v0 = vpop.f32.mrb[26].mxu1 }
 0x593   :  { %v3398_v1 = vpop.f32.mrb[27].mxu1 }
 0x594   :  { %v2879_v2 = vadd.f32 %v3396_v62, %v1438_v60 }
 0x596   :  { %v2919_v6 = vadd.f32 %v3418_v41, %v2879_v2 }
 0x598   :  { %v3355_v11 = vmul.f32 -1.442695, %v2919_v6 }
 0x59a   :  { %3968 = vpow2.f32 %v3355_v11 }
 0x5a4   :  { %v3969_v12 = vpop.eup %3968 }
 0x5a5   :  { %v2951_v14 = vadd.f32 1.0, %v3969_v12 }
 0x5a7   :  { %3970 = vrcp.f32 %v2951_v14 }
 0x5b1   :  { %v3971_v7 = vpop.eup %3970 }
 0x5b2   :  { %2972 = vst.msk [vmem:[#allocation2 + $0x30] sm:$0xff] %vm654_vm0, %v3971_v7 }
 0x5b3   :  { %3983 = shalt.err (!%p3980_p4)
}
 0x5b4   :  { %s3984_s4 = scalar_lea.hbm %s5242_s10, 896 }
 0x5b5   :  { %p3985_p5 = scmp.ne.s32.totalorder %s5242_s10, %s3984_s4  ;;  %p3988_p6 = scmp.lt.u32.totalorder %s3984_s4, %s5242_s10 }
 0x5b7   :  { %p3990_p7 = pnand %p3988_p6, %p3985_p5 }
 0x5b9   :  { %3993 = shalt.err (!%p3990_p7)
}
 0x5ba   :  { %2988 = dma.vmem_to_hbm [thread:$0]  %s2986_s9, 896, %s5242_s10, [#allocation3]  }
 0x5bb   :  { %3994 = dma.done.wait [#allocation3], 896  }
 0x5bc   :  { %3995 = vsyncadd [#allocation3], 4294966400 }
 0x5bd   :  { %3000 = vsyncpa [#allocation3], 1 }

</bundles_post_ra>
